<compile_context>
chip_gen: v7x
topology: tpu7x:2x2x1
jax: 0.10.0
libtpu: 0.0.40
codegen_flags: <defaults>
</compile_context>

<pallas_src>
import jax
import jax.numpy as jnp
from jax.experimental import pallas as pl
from jax.experimental.pallas import tpu as pltpu


# ---------------------------------------------------------------------------
# Fused Conv2x kernel: conv1 + BN + ReLU -> (VMEM "concat") -> conv2 + BN + ReLU
# ---------------------------------------------------------------------------
def _conv2x_kernel(x_ref, rem_ref, w1_ref, s1_ref, b1_ref, w2_ref, s2_ref,
                   b2_ref, o_ref, y1pad, rempad, p1_ref, p2_ref):
    _, Ho, Wo, Cout = rem_ref.shape
    Cin = x_ref.shape[-1]
    M = Ho * Wo

    # ---- conv1: 3x3 / stride 2 / pad 1 (im2col assembled in VMEM) -----------
    # x_ref holds the space-to-depth form of the zero-padded input:
    #   x_ref[0, 2*p + q, a, b, c] == x_zero_padded[2*a + p, 2*b + q, c]
    # so every stride-2 tap below is a plain unit-stride static slice.
    planes = [x_ref[0, t] for t in range(4)]            # each (Ho+1, Wo+1, Cin)
    for k in range(9):
        kh, kw = k // 3, k % 3
        src = planes[(kh % 2) * 2 + (kw % 2)]
        tap = src[kh // 2:kh // 2 + Ho, kw // 2:kw // 2 + Wo, :]
        p1_ref[:, k * Cin:(k + 1) * Cin] = tap.reshape(M, Cin)
    acc1 = jnp.dot(p1_ref[...], w1_ref[...], preferred_element_type=jnp.float32)
    y1 = jnp.maximum(acc1 * s1_ref[...] + b1_ref[...], 0.0)

    # ---- stage zero-padded conv1 output and rem in VMEM (the "concat") ------
    y1pad[...] = jnp.zeros_like(y1pad)
    rempad[...] = jnp.zeros_like(rempad)
    y1pad[1:Ho + 1, 1:Wo + 1, :] = y1.reshape(Ho, Wo, Cout)
    rempad[1:Ho + 1, 1:Wo + 1, :] = rem_ref[0].astype(rempad.dtype)

    # ---- conv2: 3x3 / stride 1 / pad 1 over concat([y1, rem], channel) ------
    # The channel concat is realised purely by the patch feature ordering:
    # for each (kh, kw): [y1 channels, rem channels] -> matches torch.cat(dim=1).
    ypv = y1pad[...]
    rpv = rempad[...]
    for k in range(9):
        kh, kw = k // 3, k % 3
        t1 = ypv[kh:kh + Ho, kw:kw + Wo, :].reshape(M, Cout)
        t2 = rpv[kh:kh + Ho, kw:kw + Wo, :].reshape(M, Cout)
        p2_ref[:, (2 * k) * Cout:(2 * k + 1) * Cout] = t1
        p2_ref[:, (2 * k + 1) * Cout:(2 * k + 2) * Cout] = t2
    acc2 = jnp.dot(p2_ref[...], w2_ref[...], preferred_element_type=jnp.float32)
    out = jnp.maximum(acc2 * s2_ref[...] + b2_ref[...], 0.0)
    o_ref[0] = out.reshape(Ho, Wo, Cout).astype(o_ref.dtype)


# ---------------------------------------------------------------------------
# Wrapper: layout prep + pallas_call.
# ---------------------------------------------------------------------------
def conv2x_forward(x_nhwc, rem_nhwc, p):
    """Conv2x.forward (deconv=False, is_3d=False, concat=True, bn=True, relu=True)."""
    N, H, W, Cin = x_nhwc.shape
    Cout = p["w1"].shape[0]
    assert H % 2 == 0 and W % 2 == 0, "even spatial dims expected for stride-2 conv"
    Ho, Wo = H // 2, W // 2
    # Mirrors torch's `assert x.size() == rem.size()` after conv1.
    assert rem_nhwc.shape == (N, Ho, Wo, Cout), (rem_nhwc.shape, (N, Ho, Wo, Cout))

    # Space-to-depth of the zero-padded input:
    #   xs[n, 2*p + q, a, b, c] == pad(x)[n, 2*a + p, 2*b + q, c]
    # This makes the in-kernel stride-2 im2col taps unit-stride slices and is
    # the only extra HBM pass (over x, the smallest tensor in the op).
    xp = jnp.pad(x_nhwc, ((0, 0), (1, 1), (1, 1), (0, 0)))
    xs = xp.reshape(N, Ho + 1, 2, Wo + 1, 2, Cin)
    xs = jnp.transpose(xs, (0, 2, 4, 1, 3, 5)).reshape(N, 4, Ho + 1, Wo + 1, Cin)

    # im2col weight matrices, feature order (kh, kw, cin); conv2's cin runs over
    # the concatenated [conv1-out, rem] channels.
    w1m = jnp.transpose(p["w1"], (2, 3, 1, 0)).reshape(9 * Cin, Cout)
    w2m = jnp.transpose(p["w2"], (2, 3, 1, 0)).reshape(9 * 2 * Cout, Cout)
    s1 = p["scale1"].reshape(1, Cout).astype(jnp.float32)
    b1 = p["bias1"].reshape(1, Cout).astype(jnp.float32)
    s2 = p["scale2"].reshape(1, Cout).astype(jnp.float32)
    b2 = p["bias2"].reshape(1, Cout).astype(jnp.float32)

    return pl.pallas_call(
        _conv2x_kernel,
        out_shape=jax.ShapeDtypeStruct((N, Ho, Wo, Cout), x_nhwc.dtype),
        grid_spec=pltpu.PrefetchScalarGridSpec(
            num_scalar_prefetch=0,
            grid=(N,),
            in_specs=[
                pl.BlockSpec((1, 4, Ho + 1, Wo + 1, Cin), lambda n: (n, 0, 0, 0, 0)),
                pl.BlockSpec((1, Ho, Wo, Cout), lambda n: (n, 0, 0, 0)),
                pl.BlockSpec((9 * Cin, Cout), lambda n: (0, 0)),
                pl.BlockSpec((1, Cout), lambda n: (0, 0)),
                pl.BlockSpec((1, Cout), lambda n: (0, 0)),
                pl.BlockSpec((9 * 2 * Cout, Cout), lambda n: (0, 0)),
                pl.BlockSpec((1, Cout), lambda n: (0, 0)),
                pl.BlockSpec((1, Cout), lambda n: (0, 0)),
            ],
            out_specs=pl.BlockSpec((1, Ho, Wo, Cout), lambda n: (n, 0, 0, 0)),
            scratch_shapes=[
                pltpu.VMEM((Ho + 2, Wo + 2, Cout), jnp.float32),    # padded conv1 out
                pltpu.VMEM((Ho + 2, Wo + 2, Cout), jnp.float32),    # padded rem
                pltpu.VMEM((Ho * Wo, 9 * Cin), jnp.float32),        # conv1 patches
                pltpu.VMEM((Ho * Wo, 9 * 2 * Cout), jnp.float32),   # conv2 patches
            ],
        ),
        compiler_params=pltpu.CompilerParams(
            dimension_semantics=("parallel",)),   # batch axis shards across TCs on v7x
    )(xs, rem_nhwc, w1m, s1, b1, w2m, s2, b2)


def fold_bn(gamma, beta, mean, var, eps=1e-5):
    scale = gamma / jnp.sqrt(var + eps)
    bias = beta - mean * scale
    return scale.astype(jnp.float32), bias.astype(jnp.float32)


# ---------------------------------------------------------------------------
# Pure-JAX reference (lax.conv) for validation.
# ---------------------------------------------------------------------------
def _ref_basic_conv(x, w_oihw, gamma, beta, mean, var, stride, pad, eps=1e-5):
    w_hwio = jnp.transpose(w_oihw, (2, 3, 1, 0))
    y = jax.lax.conv_general_dilated(
        x, w_hwio, (stride, stride), [(pad, pad), (pad, pad)],
        dimension_numbers=("NHWC", "HWIO", "NHWC"))
    y = (y - mean) / jnp.sqrt(var + eps) * gamma + beta
    return jnp.maximum(y, 0.0)


if __name__ == "__main__":
    key = jax.random.PRNGKey(0)
    N, Cin, H, W = 2, 4, 16, 16
    Cout = 8

    ks = jax.random.split(key, 12)
    # PyTorch-style NCHW inputs.
    x_nchw = jax.random.normal(ks[0], (N, Cin, H, W), jnp.float32)
    rem_nchw = jax.random.normal(ks[1], (N, Cout, H // 2, W // 2), jnp.float32)

    # conv1: Conv2d(Cin, Cout, k=3, s=2, p=1, bias=False); conv2: Conv2d(2*Cout, Cout, k=3, s=1, p=1)
    w1 = 0.1 * jax.random.normal(ks[2], (Cout, Cin, 3, 3), jnp.float32)
    w2 = 0.1 * jax.random.normal(ks[3], (Cout, 2 * Cout, 3, 3), jnp.float32)
    # BatchNorm params (inference-mode running stats + affine), deterministic.
    g1 = 1.0 + 0.1 * jax.random.normal(ks[4], (Cout,), jnp.float32)
    b1 = 0.1 * jax.random.normal(ks[5], (Cout,), jnp.float32)
    m1 = 0.1 * jax.random.normal(ks[6], (Cout,), jnp.float32)
    v1 = jax.random.uniform(ks[7], (Cout,), jnp.float32, 0.5, 1.5)
    g2 = 1.0 + 0.1 * jax.random.normal(ks[8], (Cout,), jnp.float32)
    b2 = 0.1 * jax.random.normal(ks[9], (Cout,), jnp.float32)
    m2 = 0.1 * jax.random.normal(ks[10], (Cout,), jnp.float32)
    v2 = jax.random.uniform(ks[11], (Cout,), jnp.float32, 0.5, 1.5)

    scale1, bias1 = fold_bn(g1, b1, m1, v1)
    scale2, bias2 = fold_bn(g2, b2, m2, v2)
    params = dict(w1=w1, w2=w2, scale1=scale1, bias1=bias1, scale2=scale2, bias2=bias2)

    # NCHW -> NHWC at the boundary.
    x = jnp.transpose(x_nchw, (0, 2, 3, 1))
    rem = jnp.transpose(rem_nchw, (0, 2, 3, 1))

    fwd = jax.jit(conv2x_forward)
    out = fwd(x, rem, params)
    out = jax.block_until_ready(out)
    assert out.shape == (N, H // 2, W // 2, Cout), out.shape

    # Validate against a pure-JAX reference.
    ref1 = _ref_basic_conv(x, w1, g1, b1, m1, v1, stride=2, pad=1)
    ref_cat = jnp.concatenate([ref1, rem], axis=-1)
    ref = _ref_basic_conv(ref_cat, w2, g2, b2, m2, v2, stride=1, pad=1)
    if not jnp.allclose(out, ref, atol=2e-4, rtol=1e-4):
        raise AssertionError("Pallas Conv2x output mismatch vs reference")

    print("KERNEL_OK")
</pallas_src>

<mosaic_0001>
module attributes {stable_mosaic.version = 11 : i64} {
  func.func @_conv2x_kernel(%arg0: i32, %arg1: memref<1x4x9x9x4xf32, #tpu.memory_space<vmem>>, %arg2: memref<1x8x8x8xf32, #tpu.memory_space<vmem>>, %arg3: memref<36x8xf32, #tpu.memory_space<vmem>>, %arg4: memref<1x8xf32, #tpu.memory_space<vmem>>, %arg5: memref<1x8xf32, #tpu.memory_space<vmem>>, %arg6: memref<144x8xf32, #tpu.memory_space<vmem>>, %arg7: memref<1x8xf32, #tpu.memory_space<vmem>>, %arg8: memref<1x8xf32, #tpu.memory_space<vmem>>, %arg9: memref<1x8x8x8xf32, #tpu.memory_space<vmem>>, %arg10: memref<10x10x8xf32, #tpu.memory_space<vmem>>, %arg11: memref<10x10x8xf32, #tpu.memory_space<vmem>>, %arg12: memref<64x36xf32, #tpu.memory_space<vmem>>, %arg13: memref<64x144xf32, #tpu.memory_space<vmem>>) attributes {dimension_semantics = [#tpu.dimension_semantics<parallel>], iteration_bounds = array<i64: 2>, scalar_prefetch = 0 : i64, scratch_operands = 4 : i64, tpu.core_type = #tpu.core_type<tc>, window_params = [{transform_indices = @transform_0, window_bounds = array<i64: 1, 4, 9, 9, 4>}, {transform_indices = @transform_1, window_bounds = array<i64: 1, 8, 8, 8>}, {pipeline_mode = #tpu.pipeline_mode<synchronous>, transform_indices = @transform_2, window_bounds = array<i64: 36, 8>}, {pipeline_mode = #tpu.pipeline_mode<synchronous>, transform_indices = @transform_3, window_bounds = array<i64: 1, 8>}, {pipeline_mode = #tpu.pipeline_mode<synchronous>, transform_indices = @transform_4, window_bounds = array<i64: 1, 8>}, {pipeline_mode = #tpu.pipeline_mode<synchronous>, transform_indices = @transform_5, window_bounds = array<i64: 144, 8>}, {pipeline_mode = #tpu.pipeline_mode<synchronous>, transform_indices = @transform_6, window_bounds = array<i64: 1, 8>}, {pipeline_mode = #tpu.pipeline_mode<synchronous>, transform_indices = @transform_7, window_bounds = array<i64: 1, 8>}, {transform_indices = @transform_8, window_bounds = array<i64: 1, 8, 8, 8>}]} {
    %c0 = arith.constant 0 : index
    %c0_0 = arith.constant 0 : index
    %c0_1 = arith.constant 0 : index
    %c0_2 = arith.constant 0 : index
    %c0_3 = arith.constant 0 : index
    %0 = vector.load %arg1[%c0, %c0_0, %c0_1, %c0_2, %c0_3] : memref<1x4x9x9x4xf32, #tpu.memory_space<vmem>>, vector<1x1x9x9x4xf32>
    %1 = vector.shape_cast %0 : vector<1x1x9x9x4xf32> to vector<9x9x4xf32>
    %c0_4 = arith.constant 0 : index
    %c1 = arith.constant 1 : index
    %c0_5 = arith.constant 0 : index
    %c0_6 = arith.constant 0 : index
    %c0_7 = arith.constant 0 : index
    %2 = vector.load %arg1[%c0_4, %c1, %c0_5, %c0_6, %c0_7] : memref<1x4x9x9x4xf32, #tpu.memory_space<vmem>>, vector<1x1x9x9x4xf32>
    %3 = vector.shape_cast %2 : vector<1x1x9x9x4xf32> to vector<9x9x4xf32>
    %c0_8 = arith.constant 0 : index
    %c2 = arith.constant 2 : index
    %c0_9 = arith.constant 0 : index
    %c0_10 = arith.constant 0 : index
    %c0_11 = arith.constant 0 : index
    %4 = vector.load %arg1[%c0_8, %c2, %c0_9, %c0_10, %c0_11] : memref<1x4x9x9x4xf32, #tpu.memory_space<vmem>>, vector<1x1x9x9x4xf32>
    %5 = vector.shape_cast %4 : vector<1x1x9x9x4xf32> to vector<9x9x4xf32>
    %c0_12 = arith.constant 0 : index
    %c3 = arith.constant 3 : index
    %c0_13 = arith.constant 0 : index
    %c0_14 = arith.constant 0 : index
    %c0_15 = arith.constant 0 : index
    %6 = vector.load %arg1[%c0_12, %c3, %c0_13, %c0_14, %c0_15] : memref<1x4x9x9x4xf32, #tpu.memory_space<vmem>>, vector<1x1x9x9x4xf32>
    %7 = vector.shape_cast %6 : vector<1x1x9x9x4xf32> to vector<9x9x4xf32>
    %8 = vector.extract_strided_slice %1 {offsets = [0, 0, 0], sizes = [8, 8, 4], strides = [1, 1, 1]} : vector<9x9x4xf32> to vector<8x8x4xf32>
    %9 = vector.shape_cast %8 : vector<8x8x4xf32> to vector<64x4xf32>
    %c0_16 = arith.constant 0 : index
    %c0_17 = arith.constant 0 : index
    %10 = vector.load %arg12[%c0_16, %c0_17] : memref<64x36xf32, #tpu.memory_space<vmem>>, vector<64x4xf32>
    tpu.vector_store %arg12[%c0_16, %c0_17], %9 {strides = array<i32>} : memref<64x36xf32, #tpu.memory_space<vmem>>, vector<64x4xf32>,
    %11 = vector.extract_strided_slice %3 {offsets = [0, 0, 0], sizes = [8, 8, 4], strides = [1, 1, 1]} : vector<9x9x4xf32> to vector<8x8x4xf32>
    %12 = vector.shape_cast %11 : vector<8x8x4xf32> to vector<64x4xf32>
    %c0_18 = arith.constant 0 : index
    %c4 = arith.constant 4 : index
    %13 = vector.load %arg12[%c0_18, %c4] : memref<64x36xf32, #tpu.memory_space<vmem>>, vector<64x4xf32>
    tpu.vector_store %arg12[%c0_18, %c4], %12 {strides = array<i32>} : memref<64x36xf32, #tpu.memory_space<vmem>>, vector<64x4xf32>,
    %14 = vector.extract_strided_slice %1 {offsets = [0, 1, 0], sizes = [8, 8, 4], strides = [1, 1, 1]} : vector<9x9x4xf32> to vector<8x8x4xf32>
    %15 = vector.shape_cast %14 : vector<8x8x4xf32> to vector<64x4xf32>
    %c0_19 = arith.constant 0 : index
    %c8 = arith.constant 8 : index
    %16 = vector.load %arg12[%c0_19, %c8] : memref<64x36xf32, #tpu.memory_space<vmem>>, vector<64x4xf32>
    tpu.vector_store %arg12[%c0_19, %c8], %15 {strides = array<i32>} : memref<64x36xf32, #tpu.memory_space<vmem>>, vector<64x4xf32>,
    %17 = vector.extract_strided_slice %5 {offsets = [0, 0, 0], sizes = [8, 8, 4], strides = [1, 1, 1]} : vector<9x9x4xf32> to vector<8x8x4xf32>
    %18 = vector.shape_cast %17 : vector<8x8x4xf32> to vector<64x4xf32>
    %c0_20 = arith.constant 0 : index
    %c12 = arith.constant 12 : index
    %19 = vector.load %arg12[%c0_20, %c12] : memref<64x36xf32, #tpu.memory_space<vmem>>, vector<64x4xf32>
    tpu.vector_store %arg12[%c0_20, %c12], %18 {strides = array<i32>} : memref<64x36xf32, #tpu.memory_space<vmem>>, vector<64x4xf32>,
    %20 = vector.extract_strided_slice %7 {offsets = [0, 0, 0], sizes = [8, 8, 4], strides = [1, 1, 1]} : vector<9x9x4xf32> to vector<8x8x4xf32>
    %21 = vector.shape_cast %20 : vector<8x8x4xf32> to vector<64x4xf32>
    %c0_21 = arith.constant 0 : index
    %c16 = arith.constant 16 : index
    %22 = vector.load %arg12[%c0_21, %c16] : memref<64x36xf32, #tpu.memory_space<vmem>>, vector<64x4xf32>
    tpu.vector_store %arg12[%c0_21, %c16], %21 {strides = array<i32>} : memref<64x36xf32, #tpu.memory_space<vmem>>, vector<64x4xf32>,
    %23 = vector.extract_strided_slice %5 {offsets = [0, 1, 0], sizes = [8, 8, 4], strides = [1, 1, 1]} : vector<9x9x4xf32> to vector<8x8x4xf32>
    %24 = vector.shape_cast %23 : vector<8x8x4xf32> to vector<64x4xf32>
    %c0_22 = arith.constant 0 : index
    %c20 = arith.constant 20 : index
    %25 = vector.load %arg12[%c0_22, %c20] : memref<64x36xf32, #tpu.memory_space<vmem>>, vector<64x4xf32>
    tpu.vector_store %arg12[%c0_22, %c20], %24 {strides = array<i32>} : memref<64x36xf32, #tpu.memory_space<vmem>>, vector<64x4xf32>,
    %26 = vector.extract_strided_slice %1 {offsets = [1, 0, 0], sizes = [8, 8, 4], strides = [1, 1, 1]} : vector<9x9x4xf32> to vector<8x8x4xf32>
    %27 = vector.shape_cast %26 : vector<8x8x4xf32> to vector<64x4xf32>
    %c0_23 = arith.constant 0 : index
    %c24 = arith.constant 24 : index
    %28 = vector.load %arg12[%c0_23, %c24] : memref<64x36xf32, #tpu.memory_space<vmem>>, vector<64x4xf32>
    tpu.vector_store %arg12[%c0_23, %c24], %27 {strides = array<i32>} : memref<64x36xf32, #tpu.memory_space<vmem>>, vector<64x4xf32>,
    %29 = vector.extract_strided_slice %3 {offsets = [1, 0, 0], sizes = [8, 8, 4], strides = [1, 1, 1]} : vector<9x9x4xf32> to vector<8x8x4xf32>
    %30 = vector.shape_cast %29 : vector<8x8x4xf32> to vector<64x4xf32>
    %c0_24 = arith.constant 0 : index
    %c28 = arith.constant 28 : index
    %31 = vector.load %arg12[%c0_24, %c28] : memref<64x36xf32, #tpu.memory_space<vmem>>, vector<64x4xf32>
    tpu.vector_store %arg12[%c0_24, %c28], %30 {strides = array<i32>} : memref<64x36xf32, #tpu.memory_space<vmem>>, vector<64x4xf32>,
    %32 = vector.extract_strided_slice %1 {offsets = [1, 1, 0], sizes = [8, 8, 4], strides = [1, 1, 1]} : vector<9x9x4xf32> to vector<8x8x4xf32>
    %33 = vector.shape_cast %32 : vector<8x8x4xf32> to vector<64x4xf32>
    %c0_25 = arith.constant 0 : index
    %c32 = arith.constant 32 : index
    %34 = vector.load %arg12[%c0_25, %c32] : memref<64x36xf32, #tpu.memory_space<vmem>>, vector<64x4xf32>
    tpu.vector_store %arg12[%c0_25, %c32], %33 {strides = array<i32>} : memref<64x36xf32, #tpu.memory_space<vmem>>, vector<64x4xf32>,
    %c0_26 = arith.constant 0 : index
    %c0_27 = arith.constant 0 : index
    %35 = vector.load %arg12[%c0_26, %c0_27] : memref<64x36xf32, #tpu.memory_space<vmem>>, vector<64x36xf32>
    %c0_28 = arith.constant 0 : index
    %c0_29 = arith.constant 0 : index
    %36 = vector.load %arg3[%c0_28, %c0_29] : memref<36x8xf32, #tpu.memory_space<vmem>>, vector<36x8xf32>
    %cst = arith.constant dense<0.000000e+00> : vector<64x8xf32>
    %37 = tpu.matmul %35, %36, %cst {dimension_numbers = #tpu.dot_dimension_numbers<[1], [0], [0], [1], [0, 0, 1, 1], [], []>} : vector<64x36xf32>, vector<36x8xf32>, vector<64x8xf32> -> vector<64x8xf32>
    %c0_30 = arith.constant 0 : index
    %c0_31 = arith.constant 0 : index
    %38 = vector.load %arg4[%c0_30, %c0_31] : memref<1x8xf32, #tpu.memory_space<vmem>>, vector<1x8xf32>
    %39 = vector.broadcast %38 : vector<1x8xf32> to vector<64x8xf32>
    %40 = arith.mulf %37, %39 : vector<64x8xf32>
    %c0_32 = arith.constant 0 : index
    %c0_33 = arith.constant 0 : index
    %41 = vector.load %arg5[%c0_32, %c0_33] : memref<1x8xf32, #tpu.memory_space<vmem>>, vector<1x8xf32>
    %42 = vector.broadcast %41 : vector<1x8xf32> to vector<64x8xf32>
    %43 = arith.addf %40, %42 : vector<64x8xf32>
    %cst_34 = arith.constant 0.000000e+00 : f32
    %44 = vector.broadcast %cst_34 : f32 to vector<64x8xf32>
    %45 = arith.maximumf %43, %44 : vector<64x8xf32>
    %cst_35 = arith.constant 0.000000e+00 : f32
    %46 = vector.broadcast %cst_35 : f32 to vector<10x10x8xf32>
    %c0_36 = arith.constant 0 : index
    %c0_37 = arith.constant 0 : index
    %c0_38 = arith.constant 0 : index
    %47 = vector.load %arg10[%c0_36, %c0_37, %c0_38] : memref<10x10x8xf32, #tpu.memory_space<vmem>>, vector<10x10x8xf32>
    tpu.vector_store %arg10[%c0_36, %c0_37, %c0_38], %46 {strides = array<i32>} : memref<10x10x8xf32, #tpu.memory_space<vmem>>, vector<10x10x8xf32>,
    %cst_39 = arith.constant 0.000000e+00 : f32
    %48 = vector.broadcast %cst_39 : f32 to vector<10x10x8xf32>
    %c0_40 = arith.constant 0 : index
    %c0_41 = arith.constant 0 : index
    %c0_42 = arith.constant 0 : index
    %49 = vector.load %arg11[%c0_40, %c0_41, %c0_42] : memref<10x10x8xf32, #tpu.memory_space<vmem>>, vector<10x10x8xf32>
    tpu.vector_store %arg11[%c0_40, %c0_41, %c0_42], %48 {strides = array<i32>} : memref<10x10x8xf32, #tpu.memory_space<vmem>>, vector<10x10x8xf32>,
    %50 = vector.shape_cast %45 : vector<64x8xf32> to vector<8x8x8xf32>
    %c1_43 = arith.constant 1 : index
    %c1_44 = arith.constant 1 : index
    %c0_45 = arith.constant 0 : index
    %51 = vector.load %arg10[%c1_43, %c1_44, %c0_45] : memref<10x10x8xf32, #tpu.memory_space<vmem>>, vector<8x8x8xf32>
    tpu.vector_store %arg10[%c1_43, %c1_44, %c0_45], %50 {strides = array<i32>} : memref<10x10x8xf32, #tpu.memory_space<vmem>>, vector<8x8x8xf32>,
    %c0_46 = arith.constant 0 : index
    %c0_47 = arith.constant 0 : index
    %c0_48 = arith.constant 0 : index
    %c0_49 = arith.constant 0 : index
    %52 = vector.load %arg2[%c0_46, %c0_47, %c0_48, %c0_49] : memref<1x8x8x8xf32, #tpu.memory_space<vmem>>, vector<1x8x8x8xf32>
    %53 = vector.shape_cast %52 : vector<1x8x8x8xf32> to vector<8x8x8xf32>
    %c1_50 = arith.constant 1 : index
    %c1_51 = arith.constant 1 : index
    %c0_52 = arith.constant 0 : index
    %54 = vector.load %arg11[%c1_50, %c1_51, %c0_52] : memref<10x10x8xf32, #tpu.memory_space<vmem>>, vector<8x8x8xf32>
    tpu.vector_store %arg11[%c1_50, %c1_51, %c0_52], %53 {strides = array<i32>} : memref<10x10x8xf32, #tpu.memory_space<vmem>>, vector<8x8x8xf32>,
    %c0_53 = arith.constant 0 : index
    %c0_54 = arith.constant 0 : index
    %c0_55 = arith.constant 0 : index
    %55 = vector.load %arg10[%c0_53, %c0_54, %c0_55] : memref<10x10x8xf32, #tpu.memory_space<vmem>>, vector<10x10x8xf32>
    %c0_56 = arith.constant 0 : index
    %c0_57 = arith.constant 0 : index
    %c0_58 = arith.constant 0 : index
    %56 = vector.load %arg11[%c0_56, %c0_57, %c0_58] : memref<10x10x8xf32, #tpu.memory_space<vmem>>, vector<10x10x8xf32>
    %57 = vector.extract_strided_slice %55 {offsets = [0, 0, 0], sizes = [8, 8, 8], strides = [1, 1, 1]} : vector<10x10x8xf32> to vector<8x8x8xf32>
    %58 = vector.shape_cast %57 : vector<8x8x8xf32> to vector<64x8xf32>
    %59 = vector.extract_strided_slice %56 {offsets = [0, 0, 0], sizes = [8, 8, 8], strides = [1, 1, 1]} : vector<10x10x8xf32> to vector<8x8x8xf32>
    %60 = vector.shape_cast %59 : vector<8x8x8xf32> to vector<64x8xf32>
    %c0_59 = arith.constant 0 : index
    %c0_60 = arith.constant 0 : index
    %61 = vector.load %arg13[%c0_59, %c0_60] : memref<64x144xf32, #tpu.memory_space<vmem>>, vector<64x8xf32>
    tpu.vector_store %arg13[%c0_59, %c0_60], %58 {strides = array<i32>} : memref<64x144xf32, #tpu.memory_space<vmem>>, vector<64x8xf32>,
    %c0_61 = arith.constant 0 : index
    %c8_62 = arith.constant 8 : index
    %62 = vector.load %arg13[%c0_61, %c8_62] : memref<64x144xf32, #tpu.memory_space<vmem>>, vector<64x8xf32>
    tpu.vector_store %arg13[%c0_61, %c8_62], %60 {strides = array<i32>} : memref<64x144xf32, #tpu.memory_space<vmem>>, vector<64x8xf32>,
    %63 = vector.extract_strided_slice %55 {offsets = [0, 1, 0], sizes = [8, 8, 8], strides = [1, 1, 1]} : vector<10x10x8xf32> to vector<8x8x8xf32>
    %64 = vector.shape_cast %63 : vector<8x8x8xf32> to vector<64x8xf32>
    %65 = vector.extract_strided_slice %56 {offsets = [0, 1, 0], sizes = [8, 8, 8], strides = [1, 1, 1]} : vector<10x10x8xf32> to vector<8x8x8xf32>
    %66 = vector.shape_cast %65 : vector<8x8x8xf32> to vector<64x8xf32>
    %c0_63 = arith.constant 0 : index
    %c16_64 = arith.constant 16 : index
    %67 = vector.load %arg13[%c0_63, %c16_64] : memref<64x144xf32, #tpu.memory_space<vmem>>, vector<64x8xf32>
    tpu.vector_store %arg13[%c0_63, %c16_64], %64 {strides = array<i32>} : memref<64x144xf32, #tpu.memory_space<vmem>>, vector<64x8xf32>,
    %c0_65 = arith.constant 0 : index
    %c24_66 = arith.constant 24 : index
    %68 = vector.load %arg13[%c0_65, %c24_66] : memref<64x144xf32, #tpu.memory_space<vmem>>, vector<64x8xf32>
    tpu.vector_store %arg13[%c0_65, %c24_66], %66 {strides = array<i32>} : memref<64x144xf32, #tpu.memory_space<vmem>>, vector<64x8xf32>,
    %69 = vector.extract_strided_slice %55 {offsets = [0, 2, 0], sizes = [8, 8, 8], strides = [1, 1, 1]} : vector<10x10x8xf32> to vector<8x8x8xf32>
    %70 = vector.shape_cast %69 : vector<8x8x8xf32> to vector<64x8xf32>
    %71 = vector.extract_strided_slice %56 {offsets = [0, 2, 0], sizes = [8, 8, 8], strides = [1, 1, 1]} : vector<10x10x8xf32> to vector<8x8x8xf32>
    %72 = vector.shape_cast %71 : vector<8x8x8xf32> to vector<64x8xf32>
    %c0_67 = arith.constant 0 : index
    %c32_68 = arith.constant 32 : index
    %73 = vector.load %arg13[%c0_67, %c32_68] : memref<64x144xf32, #tpu.memory_space<vmem>>, vector<64x8xf32>
    tpu.vector_store %arg13[%c0_67, %c32_68], %70 {strides = array<i32>} : memref<64x144xf32, #tpu.memory_space<vmem>>, vector<64x8xf32>,
    %c0_69 = arith.constant 0 : index
    %c40 = arith.constant 40 : index
    %74 = vector.load %arg13[%c0_69, %c40] : memref<64x144xf32, #tpu.memory_space<vmem>>, vector<64x8xf32>
    tpu.vector_store %arg13[%c0_69, %c40], %72 {strides = array<i32>} : memref<64x144xf32, #tpu.memory_space<vmem>>, vector<64x8xf32>,
    %75 = vector.extract_strided_slice %55 {offsets = [1, 0, 0], sizes = [8, 8, 8], strides = [1, 1, 1]} : vector<10x10x8xf32> to vector<8x8x8xf32>
    %76 = vector.shape_cast %75 : vector<8x8x8xf32> to vector<64x8xf32>
    %77 = vector.extract_strided_slice %56 {offsets = [1, 0, 0], sizes = [8, 8, 8], strides = [1, 1, 1]} : vector<10x10x8xf32> to vector<8x8x8xf32>
    %78 = vector.shape_cast %77 : vector<8x8x8xf32> to vector<64x8xf32>
    %c0_70 = arith.constant 0 : index
    %c48 = arith.constant 48 : index
    %79 = vector.load %arg13[%c0_70, %c48] : memref<64x144xf32, #tpu.memory_space<vmem>>, vector<64x8xf32>
    tpu.vector_store %arg13[%c0_70, %c48], %76 {strides = array<i32>} : memref<64x144xf32, #tpu.memory_space<vmem>>, vector<64x8xf32>,
    %c0_71 = arith.constant 0 : index
    %c56 = arith.constant 56 : index
    %80 = vector.load %arg13[%c0_71, %c56] : memref<64x144xf32, #tpu.memory_space<vmem>>, vector<64x8xf32>
    tpu.vector_store %arg13[%c0_71, %c56], %78 {strides = array<i32>} : memref<64x144xf32, #tpu.memory_space<vmem>>, vector<64x8xf32>,
    %81 = vector.extract_strided_slice %55 {offsets = [1, 1, 0], sizes = [8, 8, 8], strides = [1, 1, 1]} : vector<10x10x8xf32> to vector<8x8x8xf32>
    %82 = vector.shape_cast %81 : vector<8x8x8xf32> to vector<64x8xf32>
    %83 = vector.extract_strided_slice %56 {offsets = [1, 1, 0], sizes = [8, 8, 8], strides = [1, 1, 1]} : vector<10x10x8xf32> to vector<8x8x8xf32>
    %84 = vector.shape_cast %83 : vector<8x8x8xf32> to vector<64x8xf32>
    %c0_72 = arith.constant 0 : index
    %c64 = arith.constant 64 : index
    %85 = vector.load %arg13[%c0_72, %c64] : memref<64x144xf32, #tpu.memory_space<vmem>>, vector<64x8xf32>
    tpu.vector_store %arg13[%c0_72, %c64], %82 {strides = array<i32>} : memref<64x144xf32, #tpu.memory_space<vmem>>, vector<64x8xf32>,
    %c0_73 = arith.constant 0 : index
    %c72 = arith.constant 72 : index
    %86 = vector.load %arg13[%c0_73, %c72] : memref<64x144xf32, #tpu.memory_space<vmem>>, vector<64x8xf32>
    tpu.vector_store %arg13[%c0_73, %c72], %84 {strides = array<i32>} : memref<64x144xf32, #tpu.memory_space<vmem>>, vector<64x8xf32>,
    %87 = vector.extract_strided_slice %55 {offsets = [1, 2, 0], sizes = [8, 8, 8], strides = [1, 1, 1]} : vector<10x10x8xf32> to vector<8x8x8xf32>
    %88 = vector.shape_cast %87 : vector<8x8x8xf32> to vector<64x8xf32>
    %89 = vector.extract_strided_slice %56 {offsets = [1, 2, 0], sizes = [8, 8, 8], strides = [1, 1, 1]} : vector<10x10x8xf32> to vector<8x8x8xf32>
    %90 = vector.shape_cast %89 : vector<8x8x8xf32> to vector<64x8xf32>
    %c0_74 = arith.constant 0 : index
    %c80 = arith.constant 80 : index
    %91 = vector.load %arg13[%c0_74, %c80] : memref<64x144xf32, #tpu.memory_space<vmem>>, vector<64x8xf32>
    tpu.vector_store %arg13[%c0_74, %c80], %88 {strides = array<i32>} : memref<64x144xf32, #tpu.memory_space<vmem>>, vector<64x8xf32>,
    %c0_75 = arith.constant 0 : index
    %c88 = arith.constant 88 : index
    %92 = vector.load %arg13[%c0_75, %c88] : memref<64x144xf32, #tpu.memory_space<vmem>>, vector<64x8xf32>
    tpu.vector_store %arg13[%c0_75, %c88], %90 {strides = array<i32>} : memref<64x144xf32, #tpu.memory_space<vmem>>, vector<64x8xf32>,
    %93 = vector.extract_strided_slice %55 {offsets = [2, 0, 0], sizes = [8, 8, 8], strides = [1, 1, 1]} : vector<10x10x8xf32> to vector<8x8x8xf32>
    %94 = vector.shape_cast %93 : vector<8x8x8xf32> to vector<64x8xf32>
    %95 = vector.extract_strided_slice %56 {offsets = [2, 0, 0], sizes = [8, 8, 8], strides = [1, 1, 1]} : vector<10x10x8xf32> to vector<8x8x8xf32>
    %96 = vector.shape_cast %95 : vector<8x8x8xf32> to vector<64x8xf32>
    %c0_76 = arith.constant 0 : index
    %c96 = arith.constant 96 : index
    %97 = vector.load %arg13[%c0_76, %c96] : memref<64x144xf32, #tpu.memory_space<vmem>>, vector<64x8xf32>
    tpu.vector_store %arg13[%c0_76, %c96], %94 {strides = array<i32>} : memref<64x144xf32, #tpu.memory_space<vmem>>, vector<64x8xf32>,
    %c0_77 = arith.constant 0 : index
    %c104 = arith.constant 104 : index
    %98 = vector.load %arg13[%c0_77, %c104] : memref<64x144xf32, #tpu.memory_space<vmem>>, vector<64x8xf32>
    tpu.vector_store %arg13[%c0_77, %c104], %96 {strides = array<i32>} : memref<64x144xf32, #tpu.memory_space<vmem>>, vector<64x8xf32>,
    %99 = vector.extract_strided_slice %55 {offsets = [2, 1, 0], sizes = [8, 8, 8], strides = [1, 1, 1]} : vector<10x10x8xf32> to vector<8x8x8xf32>
    %100 = vector.shape_cast %99 : vector<8x8x8xf32> to vector<64x8xf32>
    %101 = vector.extract_strided_slice %56 {offsets = [2, 1, 0], sizes = [8, 8, 8], strides = [1, 1, 1]} : vector<10x10x8xf32> to vector<8x8x8xf32>
    %102 = vector.shape_cast %101 : vector<8x8x8xf32> to vector<64x8xf32>
    %c0_78 = arith.constant 0 : index
    %c112 = arith.constant 112 : index
    %103 = vector.load %arg13[%c0_78, %c112] : memref<64x144xf32, #tpu.memory_space<vmem>>, vector<64x8xf32>
    tpu.vector_store %arg13[%c0_78, %c112], %100 {strides = array<i32>} : memref<64x144xf32, #tpu.memory_space<vmem>>, vector<64x8xf32>,
    %c0_79 = arith.constant 0 : index
    %c120 = arith.constant 120 : index
    %104 = vector.load %arg13[%c0_79, %c120] : memref<64x144xf32, #tpu.memory_space<vmem>>, vector<64x8xf32>
    tpu.vector_store %arg13[%c0_79, %c120], %102 {strides = array<i32>} : memref<64x144xf32, #tpu.memory_space<vmem>>, vector<64x8xf32>,
    %105 = vector.extract_strided_slice %55 {offsets = [2, 2, 0], sizes = [8, 8, 8], strides = [1, 1, 1]} : vector<10x10x8xf32> to vector<8x8x8xf32>
    %106 = vector.shape_cast %105 : vector<8x8x8xf32> to vector<64x8xf32>
    %107 = vector.extract_strided_slice %56 {offsets = [2, 2, 0], sizes = [8, 8, 8], strides = [1, 1, 1]} : vector<10x10x8xf32> to vector<8x8x8xf32>
    %108 = vector.shape_cast %107 : vector<8x8x8xf32> to vector<64x8xf32>
    %c0_80 = arith.constant 0 : index
    %c128 = arith.constant 128 : index
    %109 = vector.load %arg13[%c0_80, %c128] : memref<64x144xf32, #tpu.memory_space<vmem>>, vector<64x8xf32>
    tpu.vector_store %arg13[%c0_80, %c128], %106 {strides = array<i32>} : memref<64x144xf32, #tpu.memory_space<vmem>>, vector<64x8xf32>,
    %c0_81 = arith.constant 0 : index
    %c136 = arith.constant 136 : index
    %110 = vector.load %arg13[%c0_81, %c136] : memref<64x144xf32, #tpu.memory_space<vmem>>, vector<64x8xf32>
    tpu.vector_store %arg13[%c0_81, %c136], %108 {strides = array<i32>} : memref<64x144xf32, #tpu.memory_space<vmem>>, vector<64x8xf32>,
    %c0_82 = arith.constant 0 : index
    %c0_83 = arith.constant 0 : index
    %111 = vector.load %arg13[%c0_82, %c0_83] : memref<64x144xf32, #tpu.memory_space<vmem>>, vector<64x144xf32>
    %c0_84 = arith.constant 0 : index
    %c0_85 = arith.constant 0 : index
    %112 = vector.load %arg6[%c0_84, %c0_85] : memref<144x8xf32, #tpu.memory_space<vmem>>, vector<144x8xf32>
    %cst_86 = arith.constant dense<0.000000e+00> : vector<64x8xf32>
    %113 = tpu.matmul %111, %112, %cst_86 {dimension_numbers = #tpu.dot_dimension_numbers<[1], [0], [0], [1], [0, 0, 1, 1], [], []>} : vector<64x144xf32>, vector<144x8xf32>, vector<64x8xf32> -> vector<64x8xf32>
    %c0_87 = arith.constant 0 : index
    %c0_88 = arith.constant 0 : index
    %114 = vector.load %arg7[%c0_87, %c0_88] : memref<1x8xf32, #tpu.memory_space<vmem>>, vector<1x8xf32>
    %115 = vector.broadcast %114 : vector<1x8xf32> to vector<64x8xf32>
    %116 = arith.mulf %113, %115 : vector<64x8xf32>
    %c0_89 = arith.constant 0 : index
    %c0_90 = arith.constant 0 : index
    %117 = vector.load %arg8[%c0_89, %c0_90] : memref<1x8xf32, #tpu.memory_space<vmem>>, vector<1x8xf32>
    %118 = vector.broadcast %117 : vector<1x8xf32> to vector<64x8xf32>
    %119 = arith.addf %116, %118 : vector<64x8xf32>
    %cst_91 = arith.constant 0.000000e+00 : f32
    %120 = vector.broadcast %cst_91 : f32 to vector<64x8xf32>
    %121 = arith.maximumf %119, %120 : vector<64x8xf32>
    %122 = vector.shape_cast %121 : vector<64x8xf32> to vector<8x8x8xf32>
    %c0_92 = arith.constant 0 : index
    %c0_93 = arith.constant 0 : index
    %c0_94 = arith.constant 0 : index
    %c0_95 = arith.constant 0 : index
    %123 = vector.load %arg9[%c0_92, %c0_93, %c0_94, %c0_95] : memref<1x8x8x8xf32, #tpu.memory_space<vmem>>, vector<1x8x8x8xf32>
    %124 = vector.shape_cast %123 : vector<1x8x8x8xf32> to vector<8x8x8xf32>
    %125 = vector.shape_cast %122 : vector<8x8x8xf32> to vector<1x8x8x8xf32>
    tpu.vector_store %arg9[%c0_92, %c0_93, %c0_94, %c0_95], %125 {strides = array<i32>} : memref<1x8x8x8xf32, #tpu.memory_space<vmem>>, vector<1x8x8x8xf32>,
    return
  }
  func.func @transform_0(%arg0: i32) -> (i32, i32, i32, i32, i32) {
    %c0_i32 = arith.constant 0 : i32
    %c0_i32_0 = arith.constant 0 : i32
    %c0_i32_1 = arith.constant 0 : i32
    %c0_i32_2 = arith.constant 0 : i32
    %c0_i32_3 = arith.constant 0 : i32
    return %arg0, %c0_i32, %c0_i32_0, %c0_i32_1, %c0_i32_2 : i32, i32, i32, i32, i32
  }
  func.func @transform_1(%arg0: i32) -> (i32, i32, i32, i32) {
    %c0_i32 = arith.constant 0 : i32
    %c0_i32_0 = arith.constant 0 : i32
    %c0_i32_1 = arith.constant 0 : i32
    %c0_i32_2 = arith.constant 0 : i32
    return %arg0, %c0_i32, %c0_i32_0, %c0_i32_1 : i32, i32, i32, i32
  }
  func.func @transform_2(%arg0: i32) -> (i32, i32) {
    %c0_i32 = arith.constant 0 : i32
    %c0_i32_0 = arith.constant 0 : i32
    %c0_i32_1 = arith.constant 0 : i32
    return %c0_i32, %c0_i32_0 : i32, i32
  }
  func.func @transform_3(%arg0: i32) -> (i32, i32) {
    %c0_i32 = arith.constant 0 : i32
    %c0_i32_0 = arith.constant 0 : i32
    %c0_i32_1 = arith.constant 0 : i32
    return %c0_i32, %c0_i32_0 : i32, i32
  }
  func.func @transform_4(%arg0: i32) -> (i32, i32) {
    %c0_i32 = arith.constant 0 : i32
    %c0_i32_0 = arith.constant 0 : i32
    %c0_i32_1 = arith.constant 0 : i32
    return %c0_i32, %c0_i32_0 : i32, i32
  }
  func.func @transform_5(%arg0: i32) -> (i32, i32) {
    %c0_i32 = arith.constant 0 : i32
    %c0_i32_0 = arith.constant 0 : i32
    %c0_i32_1 = arith.constant 0 : i32
    return %c0_i32, %c0_i32_0 : i32, i32
  }
  func.func @transform_6(%arg0: i32) -> (i32, i32) {
    %c0_i32 = arith.constant 0 : i32
    %c0_i32_0 = arith.constant 0 : i32
    %c0_i32_1 = arith.constant 0 : i32
    return %c0_i32, %c0_i32_0 : i32, i32
  }
  func.func @transform_7(%arg0: i32) -> (i32, i32) {
    %c0_i32 = arith.constant 0 : i32
    %c0_i32_0 = arith.constant 0 : i32
    %c0_i32_1 = arith.constant 0 : i32
    return %c0_i32, %c0_i32_0 : i32, i32
  }
  func.func @transform_8(%arg0: i32) -> (i32, i32, i32, i32) {
    %c0_i32 = arith.constant 0 : i32
    %c0_i32_0 = arith.constant 0 : i32
    %c0_i32_1 = arith.constant 0 : i32
    %c0_i32_2 = arith.constant 0 : i32
    return %arg0, %c0_i32, %c0_i32_0, %c0_i32_1 : i32, i32, i32, i32
  }
}

</mosaic_0001>

<bundles_post_ra>
// kernel: conv2x_forward.1
= control target key start
LH: loop header
LB: loop body
LE: loop exit
PB: predicated region body
PF: predicated region fallthrough
CT: control target
= control target key end

     0   :  { %13 = vsyncpa [#allocation7], 0  ;;  %s3664_s0 = inlined_call_operand.vmem [shape: f32[2,4,9,9,4], index: 0, kind: input, shape index: {}]   ;;  %s3665_s1 = inlined_call_operand.vmem [shape: f32[2,8,8,8], index: 1, kind: input, shape index: {}]   ;;  %s3666_s2 = inlined_call_operand.vmem [shape: f32[36,8], index: 2, kind: input, shape index: {}]   ;;  %s3667_s3 = inlined_call_operand.vmem [shape: f32[1,8], index: 3, kind: input, shape index: {}]   ;;  %s3668_s4 = inlined_call_operand.vmem [shape: f32[1,8], index: 4, kind: input, shape index: {}]   ;;  %s3669_s5 = inlined_call_operand.vmem [shape: f32[144,8], index: 5, kind: input, shape index: {}]   ;;  %s3670_s6 = inlined_call_operand.vmem [shape: f32[1,8], index: 6, kind: input, shape index: {}]   ;;  %s3671_s7 = inlined_call_operand.vmem [shape: f32[1,8], index: 7, kind: input, shape index: {}]   ;;  %s3672_s8 = inlined_call_operand.hbm [shape: f32[2,8,8,8], index: 8, kind: output, shape index: {}]  }
   0x1   :  { %15 = vsyncpa [#allocation7 + $0x1], 0  ;;  %s2408_s27 = smov 0   ;;  %s2410_s28 = smov 0  }
   0x2   :  { %s2412_s29 = smov 0   ;;  %s2414_s30 = smov 0  }
   0x3 LB: > { %s2429_s9 = sadd.s32 4294967295, %s2338_s30   ;;  %s2057_s10 = sadd.s32 4294967294, %s2338_s30   ;;  %s2338_s30 = sphi %s2414_s30, %s3711_s30   ;;  %s2334_s29 = sphi %s2412_s29, %s3710_s29   ;;  %s2330_s28 = sphi %s2410_s28, %s3709_s28   ;;  %s2326_s27 = sphi %s2408_s27, %s3708_s27  }
   0x4   : > { %s2433_s11 = sadd.s32 1, %s2338_s30   ;;  %s206_s12 = sadd.s32 1, %s2334_s29 }
   0x5   : > { %s203_s13 = ssub.s32 %s2338_s30, %s2433_s11  ;;  %p216_p0 = scmp.ne.s32.totalorder %s2334_s29, %s2330_s28 }
   0x6   : > { %p204_p1 = scmp.eq.s32.totalorder %s203_s13, 0  ;;  %p217_p2 = scmp.eq.s32.totalorder %s2429_s9, 1 }
   0x7   : > { %p222_p3 = scmp.ne.s32.totalorder %s2330_s28, %s2326_s27  ;;  %p223_p4 = scmp.eq.s32.totalorder %s2057_s10, 1 }
   0x8   : > { %s2444_s14 = scalar_select %p204_p1, %s2334_s29, %s206_s12  }
   0x9   : > { %p2446_p5 = por %p217_p2, %p216_p0  ;;  %p2450_p6 = por %p223_p4, %p222_p3 }
   0xa   : > { %p2060_p7 = scmp.ge.s32.totalorder %s2338_s30, 1  ;;  %p275_p8 = scmp.lt.s32.totalorder %s2338_s30, 3 }
   0xc   : > { %p276_p9 = pnand %p2060_p7, %p275_p8 }
   0xe   : > { %279 = sbr.rel (%p276_p9) target bundleno = 912 (0x390), region = 52 }
  0x15   : > { %p314_p10 = scmp.lt.s32.totalorder %s2429_s9, 1  ;;  %vm378_vm0 = vcmask 31744   ;;  %s2340_s22 = smov 12   ;;  %vm444_vm1 = vcmask 1046528   ;;  %v762_v41 = vld [vmem:[%s3666_s2] sm:$0xff]  ;;  %v763_v42 = vld [vmem:[%s3666_s2 + $0x8] sm:$0xff] }
  0x16   : > { %s3675_s23 = smov 4   ;;  %s3673_s24 = smov 8   ;;  %v2161_v43 = vpack.c.bf16 %v763_v42, %v762_v41  ;;  %v764_v47 = vld [vmem:[%s3666_s2 + $0x10] sm:$0xff]  ;;  %v765_v48 = vld [vmem:[%s3666_s2 + $0x18] sm:$0xff]  ;;  %v766_v53 = vld [vmem:[%s3666_s2 + $0x20] sm:$0xf] }
  0x17   : > { %s2458_s17 = scalar_select %p314_p10, %s2429_s9, 1  ;;  %v2165_v49 = vpack.c.bf16 %v765_v48, %v764_v47  ;;  %vm792_vm2 = vcmask 1043456   ;;  %vm3681_vm3 = vcmask 64512   ;;  %vm941_vm4 = vcmask 58368  }
  0x18   : > { %s2343_s25 = smov 16   ;;  %s2344_s26 = smov 20   ;;  %2162 = vmatprep.subr.bf16.mxu0 %v2161_v43  ;;  %vm419_vm5 = vcmask 64544   ;;  %vm493_vm6 = vcmask 97344   ;;  %vm534_vm7 = vcmask 130144   ;;  %vm1234_vm8 = vcmask 1045504  }
  0x19   : > { %s2214_s18 = smul.u32 576, %s2458_s17  ;;  %s2345_s10 = smov 24   ;;  %2164 = vmatpush3.bf16.msra.mxu0 %v2161_v43  ;;  %vm575_vm9 = vcmask 162944   ;;  %vm640_vm10 = vcmask 195744   ;;  %vm674_vm11 = vcmask 228544   ;;  %vm708_vm12 = vcmask 261344  }
  0x1a   : > { %s2346_s20 = smov 28   ;;  %2166 = vmatprep.subr.bf16.mxu0 %v2165_v49  ;;  %s3685_s12 = smov 8   ;;  %vm745_vm13 = vcmask 294144   ;;  %vm767_vm14 = vcmask 293888   ;;  %vm1192_vm15 = vcmask 195712  }
  0x1b   : > { %s2464_s21 = scalar_lea.vmem %s3664_s0, %s2214_s18  ;;  %s2124_s13 = sshll.u32 %s2458_s17, 6 }
  0x1c   : > { %v2467_v0 = vld [vmem:[%s2464_s21 + $0x130] sm:$0xff]  ;;  %v324_v2 = vld [vmem:[%s2464_s21] sm:$0xff]  ;;  %v325_v3 = vld [vmem:[%s2464_s21 + $0x8] sm:$0x1]  ;;  %s3686_s17 = smov 32   ;;  %s2358_s19 = smov 64  }
  0x1d   : > { %v2065_v1 = vld [vmem:[%s2464_s21 + $0x90] sm:$0xff]  ;;  %512 = vrot.lane.b32.xlu1 %v2467_v0, %s2340_s22  ;;  %v2476_v4 = vld [vmem:[%s2464_s21 + $0xa0] sm:$0xff]  ;;  %v445_v5 = vrot.slane %v324_v2, 1  ;;  %v446_v6 = vrot.slane %v325_v3, 1  ;;  %v327_v8 = vld [vmem:[%s2464_s21 + $0x18] sm:$0x1]  ;;  %2168 = vmatpush3.bf16.msra.mxu0 %v2165_v49 }
  0x1e   : > { %395 = vrot.lane.b32.xlu0 %v2065_v1, %s3675_s23  ;;  %v326_v7 = vld [vmem:[%s2464_s21 + $0x10] sm:$0xff]  ;;  %379 = vst.msk [vmem:[#allocation4] sm:$0xff] %vm378_vm0, %v324_v2  ;;  %v449_v10 = vrot.slane %v327_v8, 1  ;;  %v328_v12 = vld [vmem:[%s2464_s21 + $0x20] sm:$0xff]  ;;  %v2075_v16 = vld [vmem:[%s2464_s21 + $0x128] sm:$0x1]  ;;  %2147 = vmatprep.subr.msk.mxu0 %vm792_vm2, %v766_v53 }
  0x1f   : > { %v448_v9 = vrot.slane %v326_v7, 1  ;;  %380 = vst.msk [vmem:[#allocation4 + $0x8] sm:$0xff] %vm378_vm0, %v326_v7  ;;  %v447_v11 = vsel %vm444_vm1, %v445_v5, %v446_v6  ;;  %381 = vst.msk [vmem:[#allocation4 + $0x10] sm:$0xff] %vm378_vm0, %v328_v12  ;;  %v2074_v13 = vld [vmem:[%s2464_s21 + $0x120] sm:$0xff]  ;;  %v2493_v15 = vld [vmem:[%s2464_s21 + $0x30] sm:$0xff]  ;;  %v593_v21 = vrot.slane %v2075_v16, 1 }
  0x20   : > { %382 = vst.msk [vmem:[#allocation4 + $0x18] sm:$0xff] %vm378_vm0, %v2493_v15  ;;  %v2499_v17 = vld [vmem:[%s2464_s21 + $0x40] sm:$0xff]  ;;  %v592_v18 = vrot.slane %v2074_v13, 1  ;;  %v2090_v19 = vld [vmem:[%s2464_s21 + $0x1b0] sm:$0xff]  ;;  %v329_v23 = vld [vmem:[%s2464_s21 + $0x28] sm:$0x1] }
  0x21   : > { %469 = vrot.lane.b32.xlu1 %v447_v11, %s3673_s24  ;;  %v2490_v14 = vsel %vm444_vm1, %v448_v9, %v449_v10  ;;  %383 = vst.msk [vmem:[#allocation4 + $0x20] sm:$0xff] %vm378_vm0, %v2499_v17  ;;  %v2067_v20 = vld [vmem:[%s2464_s21 + $0xb0] sm:$0xff]  ;;  %v2515_v24 = vld [vmem:[%s2464_s21 + $0x60] sm:$0xff]  ;;  %v451_v27 = vrot.slane %v328_v12, 1  ;;  %v452_v28 = vrot.slane %v329_v23, 1  ;;  %v595_v31 = vrot.slane %v2467_v0, 1  ;;  %2148 = vmatpush3.msk.msra.mxu0 %vm792_vm2, %v766_v53 }
  0x22   : > { %397 = vrot.lane.b32.xlu0 %v2476_v4, %s3675_s23  ;;  %v2509_v22 = vld [vmem:[%s2464_s21 + $0x50] sm:$0xff]  ;;  %385 = vst.msk [vmem:[#allocation4 + $0x30] sm:$0xff] %vm378_vm0, %v2515_v24  ;;  %v2091_v25 = vld [vmem:[%s2464_s21 + $0x1c0] sm:$0xff]  ;;  %v594_v26 = vsel %vm444_vm1, %v592_v18, %v593_v21  ;;  %v2077_v30 = vld [vmem:[%s2464_s21 + $0x138] sm:$0x1]  ;;  %v454_v37 = vrot.slane %v2493_v15, 1 }
  0x23   : > { %384 = vst.msk [vmem:[#allocation4 + $0x28] sm:$0xff] %vm378_vm0, %v2509_v22  ;;  %v2524_v29 = vld [vmem:[%s2464_s21 + $0x70] sm:$0xff]  ;;  %v2068_v32 = vld [vmem:[%s2464_s21 + $0xc0] sm:$0xff]  ;;  %v453_v33 = vsel %vm444_vm1, %v451_v27, %v452_v28  ;;  %v596_v34 = vrot.slane %v2077_v30, 1  ;;  %v331_v35 = vld [vmem:[%s2464_s21 + $0x38] sm:$0x1] }
  0x24   : > { %386 = vst.msk [vmem:[#allocation4 + $0x38] sm:$0xff] %vm378_vm0, %v2524_v29  ;;  %v455_v38 = vrot.slane %v331_v35, 1  ;;  %v2078_v40 = vld [vmem:[%s2464_s21 + $0x140] sm:$0xff]  ;;  %v2080_v44 = vld [vmem:[%s2464_s21 + $0x150] sm:$0xff]  ;;  %v2079_v46 = vld [vmem:[%s2464_s21 + $0x148] sm:$0x1] }
  0x25   : > { %471 = vrot.lane.b32.xlu1 %v2490_v14, %s3673_s24  ;;  %v597_v36 = vsel %vm444_vm1, %v595_v31, %v596_v34  ;;  %v2092_v45 = vld [vmem:[%s2464_s21 + $0x1d0] sm:$0xff]  ;;  %v598_v50 = vrot.slane %v2078_v40, 1  ;;  %v599_v51 = vrot.slane %v2079_v46, 1  ;;  %v2081_v52 = vld [vmem:[%s2464_s21 + $0x158] sm:$0x1]  ;;  %v601_v54 = vrot.slane %v2080_v44, 1 }
  0x26   : > { %510 = vrot.lane.b32.xlu0 %v2074_v13, %s2340_s22  ;;  %v456_v39 = vsel %vm444_vm1, %v454_v37, %v455_v38  ;;  %v2093_v55 = vld [vmem:[%s2464_s21 + $0x1e0] sm:$0xff]  ;;  %v602_v57 = vrot.slane %v2081_v52, 1  ;;  %v2069_v59 = vld [vmem:[%s2464_s21 + $0xd0] sm:$0xff]  ;;  %v333_v60 = vld [vmem:[%s2464_s21 + $0x48] sm:$0x1]  ;;  %v457_v61 = vrot.slane %v2499_v17, 1 }
  0x27   : > { %v600_v56 = vsel %vm444_vm1, %v598_v50, %v599_v51  ;;  %v458_v62 = vrot.slane %v333_v60, 1  ;;  %v335_v63 = vld [vmem:[%s2464_s21 + $0x58] sm:$0x1]  ;;  %v2070_v1 = vld [vmem:[%s2464_s21 + $0xe0] sm:$0xff]  ;;  %v460_v2 = vrot.slane %v2509_v22, 1  ;;  %v2084_v6 = vld [vmem:[%s2464_s21 + $0x170] sm:$0xff] }
  0x28   : > { %v603_v58 = vsel %vm444_vm1, %v601_v54, %v602_v57  ;;  %v461_v3 = vrot.slane %v335_v63, 1  ;;  %v2082_v5 = vld [vmem:[%s2464_s21 + $0x160] sm:$0xff]  ;;  %v2085_v8 = vld [vmem:[%s2464_s21 + $0x178] sm:$0x1]  ;;  %v607_v10 = vrot.slane %v2084_v6, 1  ;;  %v2094_v11 = vld [vmem:[%s2464_s21 + $0x1f0] sm:$0xff] }
  0x29   : > { %399 = vrot.lane.b32.xlu1 %v2067_v20, %s3675_s23  ;;  %v459_v0 = vsel %vm444_vm1, %v457_v61, %v458_v62  ;;  %v604_v9 = vrot.slane %v2082_v5, 1  ;;  %v337_v18 = vld [vmem:[%s2464_s21 + $0x68] sm:$0x1]  ;;  %v339_v21 = vld [vmem:[%s2464_s21 + $0x78] sm:$0x1]  ;;  %v2627_v23 = vld [vmem:[%s2464_s21 + $0x100] sm:$0xff] }
  0x2a   : > { %551 = vrot.lane.b32.xlu0 %v2090_v19, %s2343_s25  ;;  %v463_v19 = vrot.slane %v2515_v24, 1  ;;  %v2640_v27 = vld [vmem:[%s2464_s21 + $0x180] sm:$0xff]  ;;  %v2643_v28 = vld [vmem:[%s2464_s21 + $0x190] sm:$0xff]  ;;  %v2087_v30 = vld [vmem:[%s2464_s21 + $0x188] sm:$0x1]  ;;  %vm1087_vm0 = vcmask 130112  }
  0x2b   : > { %v2089_v31 = vld [vmem:[%s2464_s21 + $0x198] sm:$0x1]  ;;  %v610_v34 = vrot.slane %v2640_v27, 1  ;;  %v613_v35 = vrot.slane %v2643_v28, 1  ;;  %v2097_v37 = vld [vmem:[%s2464_s21 + $0x220] sm:$0xff]  ;;  %v611_v38 = vrot.slane %v2087_v30, 1 }
  0x2c   : > { %v340_v43 = vld [vmem:[%s2464_s21 + $0x80] sm:$0xff]  ;;  %v341_v46 = vld [vmem:[%s2464_s21 + $0x88] sm:$0x1]  ;;  %v2073_v48 = vld [vmem:[%s2464_s21 + $0x110] sm:$0xff]  ;;  %vm1225_vm2 = vcmask 261312   ;;  %s2360_s18 = smov 112  }
  0x2d   : > { %616 = vrot.lane.b32.xlu1 %v594_v26, %s2344_s26  ;;  %v467_v26 = vrot.slane %v339_v21, 1  ;;  %v718_v47 = vrot.slane %v340_v43, 1  ;;  %v719_v49 = vrot.slane %v341_v46, 1 }
  0x2e   : > { %553 = vrot.lane.b32.xlu0 %v2091_v25, %s2343_s25  ;;  %v466_v25 = vrot.slane %v2524_v29, 1 }
  0x2f   : > { %v720_v52 = vsel %vm444_vm1, %v718_v47, %v719_v49 }
  0x31   : > { %473 = vrot.lane.b32.xlu1 %v453_v33, %s3673_s24 }
  0x32   : > { %401 = vrot.lane.b32.xlu0 %v2068_v32, %s3675_s23  ;;  %s3684_s23 = smov 4  }
  0x35   : > { %650 = vrot.lane.b32.xlu1 %v326_v7, %s2345_s10  ;;  %v2083_v7 = vld [vmem:[%s2464_s21 + $0x168] sm:$0x1] }
  0x36   : > { %618 = vrot.lane.b32.xlu0 %v597_v36, %s2344_s26  ;;  %v605_v13 = vrot.slane %v2083_v7, 1  ;;  %v2096_v36 = vld [vmem:[%s2464_s21 + $0x210] sm:$0xff] }
  0x39   : > { %514 = vrot.lane.b32.xlu1 %v2078_v40, %s2340_s22  ;;  %v612_v40 = vsel %vm444_vm1, %v610_v34, %v611_v38 }
  0x3a   : > { %475 = vrot.lane.b32.xlu0 %v456_v39, %s3673_s24  ;;  %s3677_s24 = smov 32  }
  0x3d   : > { %684 = vrot.lane.b32.xlu1 %v2476_v4, %s2346_s20  ;;  %v462_v4 = vsel %vm444_vm1, %v460_v2, %v461_v3 }
  0x3e   : > { %652 = vrot.lane.b32.xlu0 %v328_v12, %s2345_s10  ;;  %v2095_v12 = vld [vmem:[%s2464_s21 + $0x200] sm:$0xff] }
  0x41   : > { %555 = vrot.lane.b32.xlu1 %v2092_v45, %s2343_s25 }
  0x42   : > { %516 = vrot.lane.b32.xlu0 %v2080_v44, %s2340_s22 }
  0x45   : > { %721 = vrot.lane.b32.xlu1 %v2490_v14, %s3677_s24  ;;  %v608_v14 = vrot.slane %v2085_v8, 1 }
  0x46   : > { %686 = vrot.lane.b32.xlu0 %v2067_v20, %s2346_s20  ;;  %v464_v20 = vrot.slane %v337_v18, 1 }
  0x47   : > { %v609_v16 = vsel %vm444_vm1, %v607_v10, %v608_v14 }
  0x49   : > { %620 = vrot.lane.b32.xlu1 %v600_v56, %s2344_s26 }
  0x4a   : > { %557 = vrot.lane.b32.xlu0 %v2093_v55, %s2343_s25 }
  0x4d   : > { %622 = vrot.lane.b32.xlu1 %v603_v58, %s2344_s26 }
  0x4e   : > { %723 = vrot.lane.b32.xlu0 %v453_v33, %s3677_s24 }
  0x51   : > { %656 = vrot.lane.b32.xlu1 %v2499_v17, %s2345_s10  ;;  %v2071_v17 = vld [vmem:[%s2464_s21 + $0xf0] sm:$0xff]  ;;  %s2349_s21 = smov 40  }
  0x52   : > { %654 = vrot.lane.b32.xlu0 %v2493_v15, %s2345_s10  ;;  %v606_v15 = vsel %vm444_vm1, %v604_v9, %v605_v13 }
  0x55   : > { %690 = vrot.lane.b32.xlu1 %v2069_v59, %s2346_s20 }
  0x56   : > { %688 = vrot.lane.b32.xlu0 %v2068_v32, %s2346_s20  ;;  %v2348_v32 = vmov 0.0  }
  0x57   : > { %965 = vst.msk [vmem:[#allocation3 + $0x20] sm:$0xff] %vm3681_vm3, %v2348_v32  ;;  %940 = vst.msk [vmem:[#allocation2] sm:$0xff] %vm3681_vm3, %v2348_v32 }
  0x58   : > { %966 = vst.msk [vmem:[#allocation3 + $0x28] sm:$0x3] %vm941_vm4, %v2348_v32  ;;  %942 = vst.msk [vmem:[#allocation2 + $0x8] sm:$0x3] %vm941_vm4, %v2348_v32 }
  0x59   : > { %403 = vrot.lane.b32.xlu1 %v2069_v59, %s3684_s23  ;;  %943 = vst.msk [vmem:[#allocation2 + $0x10] sm:$0xff] %vm3681_vm3, %v2348_v32  ;;  %945 = vst.msk [vmem:[#allocation2 + $0x20] sm:$0xff] %vm3681_vm3, %v2348_v32 }
  0x5a   : > { %725 = vrot.lane.b32.xlu0 %v456_v39, %s3677_s24  ;;  %944 = vst.msk [vmem:[#allocation2 + $0x18] sm:$0x3] %vm941_vm4, %v2348_v32  ;;  %946 = vst.msk [vmem:[#allocation2 + $0x28] sm:$0x3] %vm941_vm4, %v2348_v32  ;;  %v614_v39 = vrot.slane %v2089_v31, 1 }
  0x5b   : > { %947 = vst.msk [vmem:[#allocation2 + $0x30] sm:$0xff] %vm3681_vm3, %v2348_v32  ;;  %949 = vst.msk [vmem:[#allocation2 + $0x40] sm:$0xff] %vm3681_vm3, %v2348_v32 }
  0x5c   : > { %948 = vst.msk [vmem:[#allocation2 + $0x38] sm:$0x3] %vm941_vm4, %v2348_v32  ;;  %950 = vst.msk [vmem:[#allocation2 + $0x48] sm:$0x3] %vm941_vm4, %v2348_v32  ;;  %v615_v41 = vsel %vm444_vm1, %v613_v35, %v614_v39 }
  0x5d   : > { %405 = vrot.lane.b32.xlu1 %v2070_v1, %s3684_s23  ;;  %951 = vst.msk [vmem:[#allocation2 + $0x50] sm:$0xff] %vm3681_vm3, %v2348_v32  ;;  %953 = vst.msk [vmem:[#allocation2 + $0x60] sm:$0xff] %vm3681_vm3, %v2348_v32 }
  0x5e   : > { %727 = vrot.lane.b32.xlu0 %v459_v0, %s3677_s24  ;;  %952 = vst.msk [vmem:[#allocation2 + $0x58] sm:$0x3] %vm941_vm4, %v2348_v32  ;;  %954 = vst.msk [vmem:[#allocation2 + $0x68] sm:$0x3] %vm941_vm4, %v2348_v32  ;;  %v2734_v61 = vld [vmem:[#allocation2] sm:$0xff] }
  0x5f   : > { %955 = vst.msk [vmem:[#allocation2 + $0x70] sm:$0xff] %vm3681_vm3, %v2348_v32  ;;  %957 = vst.msk [vmem:[#allocation2 + $0x80] sm:$0xff] %vm3681_vm3, %v2348_v32  ;;  %v2821_v46 = vld [vmem:[#allocation2 + $0x8] sm:$0x3]  ;;  %v1112_v47 = vrot.slane %v2734_v61, 1 }
  0x60   : > { %956 = vst.msk [vmem:[#allocation2 + $0x78] sm:$0x3] %vm941_vm4, %v2348_v32  ;;  %958 = vst.msk [vmem:[#allocation2 + $0x88] sm:$0x3] %vm941_vm4, %v2348_v32 }
  0x61   : > { %479 = vrot.lane.b32.xlu1 %v462_v4, %s3685_s12  ;;  %959 = vst.msk [vmem:[#allocation2 + $0x90] sm:$0xff] %vm3681_vm3, %v2348_v32  ;;  %961 = vst.msk [vmem:[#allocation3] sm:$0xff] %vm3681_vm3, %v2348_v32 }
  0x62   : > { %477 = vrot.lane.b32.xlu0 %v459_v0, %s3685_s12  ;;  %960 = vst.msk [vmem:[#allocation2 + $0x98] sm:$0x3] %vm941_vm4, %v2348_v32  ;;  %962 = vst.msk [vmem:[#allocation3 + $0x8] sm:$0x3] %vm941_vm4, %v2348_v32 }
  0x63   : > { %963 = vst.msk [vmem:[#allocation3 + $0x10] sm:$0xff] %vm3681_vm3, %v2348_v32  ;;  %967 = vst.msk [vmem:[#allocation3 + $0x30] sm:$0xff] %vm3681_vm3, %v2348_v32 }
  0x64   : > { %964 = vst.msk [vmem:[#allocation3 + $0x18] sm:$0x3] %vm941_vm4, %v2348_v32  ;;  %968 = vst.msk [vmem:[#allocation3 + $0x38] sm:$0x3] %vm941_vm4, %v2348_v32 }
  0x65   : > { %520 = vrot.lane.b32.xlu1 %v2084_v6, %s2340_s22  ;;  %969 = vst.msk [vmem:[#allocation3 + $0x40] sm:$0xff] %vm3681_vm3, %v2348_v32  ;;  %971 = vst.msk [vmem:[#allocation3 + $0x50] sm:$0xff] %vm3681_vm3, %v2348_v32 }
  0x66   : > { %518 = vrot.lane.b32.xlu0 %v2082_v5, %s2340_s22  ;;  %970 = vst.msk [vmem:[#allocation3 + $0x48] sm:$0x3] %vm941_vm4, %v2348_v32  ;;  %972 = vst.msk [vmem:[#allocation3 + $0x58] sm:$0x3] %vm941_vm4, %v2348_v32 }
  0x67   : > { %973 = vst.msk [vmem:[#allocation3 + $0x60] sm:$0xff] %vm3681_vm3, %v2348_v32  ;;  %975 = vst.msk [vmem:[#allocation3 + $0x70] sm:$0xff] %vm3681_vm3, %v2348_v32 }
  0x68   : > { %974 = vst.msk [vmem:[#allocation3 + $0x68] sm:$0x3] %vm941_vm4, %v2348_v32  ;;  %976 = vst.msk [vmem:[#allocation3 + $0x78] sm:$0x3] %vm941_vm4, %v2348_v32 }
  0x69   : > { %561 = vrot.lane.b32.xlu1 %v2095_v12, %s2343_s25  ;;  %977 = vst.msk [vmem:[#allocation3 + $0x80] sm:$0xff] %vm3681_vm3, %v2348_v32  ;;  %979 = vst.msk [vmem:[#allocation3 + $0x90] sm:$0xff] %vm3681_vm3, %v2348_v32 }
  0x6a   : > { %559 = vrot.lane.b32.xlu0 %v2094_v11, %s2343_s25  ;;  %978 = vst.msk [vmem:[#allocation3 + $0x88] sm:$0x3] %vm941_vm4, %v2348_v32  ;;  %980 = vst.msk [vmem:[#allocation3 + $0x98] sm:$0x3] %vm941_vm4, %v2348_v32  ;;  %vm1307_vm4 = vcmask 326912  }
  0x6b   : > { %1047 = vst.msk [vmem:[#allocation5] sm:$0xff] %vm3681_vm3, %v2734_v61 }
  0x6d   : > { %626 = vrot.lane.b32.xlu1 %v609_v16, %s2344_s26 }
  0x6e   : > { %624 = vrot.lane.b32.xlu0 %v606_v15, %s2344_s26 }
  0x71   : > { %660 = vrot.lane.b32.xlu1 %v2515_v24, %s2345_s10  ;;  %v2634_v24 = vsel %vm444_vm1, %v466_v25, %v467_v26 }
  0x72   : > { %658 = vrot.lane.b32.xlu0 %v2509_v22, %s2345_s10  ;;  %v465_v22 = vsel %vm444_vm1, %v463_v19, %v464_v20 }
  0x75   : > { %694 = vrot.lane.b32.xlu1 %v2071_v17, %s2346_s20 }
  0x76   : > { %692 = vrot.lane.b32.xlu0 %v2070_v1, %s2346_s20 }
  0x79   : > { %407 = vrot.lane.b32.xlu1 %v2071_v17, %s3684_s23 }
  0x7a   : > { %729 = vrot.lane.b32.xlu0 %v462_v4, %s3677_s24 }
  0x7d   : > { %409 = vrot.lane.b32.xlu1 %v2627_v23, %s3684_s23  ;;  %s2354_s23 = smov 120  }
  0x7e   : > { %731 = vrot.lane.b32.xlu0 %v465_v22, %s3677_s24  ;;  %s2651_s24 = scalar_lea.vmem %s3665_s1, %s2124_s13 }
  0x7f   : > { %v991_v33 = vld [vmem:[%s2651_s24 + $0x8] sm:$0xff]  ;;  %v992_v42 = vld [vmem:[%s2651_s24 + $0x10] sm:$0xff]  ;;  %v994_v59 = vld [vmem:[%s2651_s24 + $0x20] sm:$0xff] }
  0x80   : > { %1000 = vst.msk [vmem:[#allocation3 + $0x21] sm:$0xff] %vm3681_vm3, %v991_v33  ;;  %1001 = vst.msk [vmem:[#allocation3 + $0x31] sm:$0xff] %vm3681_vm3, %v992_v42  ;;  %v995_v60 = vld [vmem:[%s2651_s24 + $0x28] sm:$0xff]  ;;  %v990_v62 = vld [vmem:[%s2651_s24] sm:$0xff] }
  0x81   : > { %483 = vrot.lane.b32.xlu1 %v2634_v24, %s3685_s12  ;;  %1003 = vst.msk [vmem:[#allocation3 + $0x51] sm:$0xff] %vm3681_vm3, %v994_v59  ;;  %1004 = vst.msk [vmem:[#allocation3 + $0x61] sm:$0xff] %vm3681_vm3, %v995_v60  ;;  %v996_v2 = vld [vmem:[%s2651_s24 + $0x30] sm:$0xff]  ;;  %v997_v3 = vld [vmem:[%s2651_s24 + $0x38] sm:$0xff] }
  0x82   : > { %481 = vrot.lane.b32.xlu0 %v465_v22, %s3685_s12  ;;  %999 = vst.msk [vmem:[#allocation3 + $0x11] sm:$0xff] %vm3681_vm3, %v990_v62  ;;  %1005 = vst.msk [vmem:[#allocation3 + $0x71] sm:$0xff] %vm3681_vm3, %v996_v2 }
  0x83   : > { %1006 = vst.msk [vmem:[#allocation3 + $0x81] sm:$0xff] %vm3681_vm3, %v997_v3 }
  0x85   : > { %524 = vrot.lane.b32.xlu1 %v2643_v28, %s2340_s22 }
  0x86   : > { %522 = vrot.lane.b32.xlu0 %v2640_v27, %s2340_s22  ;;  %s2350_s22 = smov 56  }
  0x87   : > { %v2725_v53 = vld [vmem:[#allocation3 + $0x20] sm:$0xff]  ;;  %v1032_v54 = vld [vmem:[#allocation3 + $0x28] sm:$0x3]  ;;  %v2762_v9 = vld [vmem:[#allocation3 + $0x30] sm:$0xff] }
  0x88   : > { %v1265_v57 = vrot.slane %v2725_v53, 2  ;;  %v1266_v58 = vrot.slane %v1032_v54, 2  ;;  %v1150_v63 = vrot.slane %v2725_v53, 1  ;;  %v1151_v0 = vrot.slane %v1032_v54, 1  ;;  %v1034_v10 = vld [vmem:[#allocation3 + $0x38] sm:$0x3] }
  0x89   : > { %565 = vrot.lane.b32.xlu1 %v2097_v37, %s2343_s25  ;;  %v1268_v11 = vrot.slane %v2762_v9, 2  ;;  %v1269_v12 = vrot.slane %v1034_v10, 2  ;;  %v1153_v13 = vrot.slane %v2762_v9, 1  ;;  %v1154_v14 = vrot.slane %v1034_v10, 1  ;;  %v2789_v27 = vld [vmem:[#allocation3 + $0x58] sm:$0x3] }
  0x8a   : > { %563 = vrot.lane.b32.xlu0 %v2096_v36, %s2343_s25  ;;  %v2747_v1 = vsel %vm1234_vm8, %v1265_v57, %v1266_v58  ;;  %v2760_v6 = vsel %vm444_vm1, %v1150_v63, %v1151_v0  ;;  %v2795_v30 = vld [vmem:[#allocation3 + $0x50] sm:$0xff]  ;;  %v1160_v34 = vrot.slane %v2789_v27, 1 }
  0x8b   : > { %v2775_v17 = vsel %vm1234_vm8, %v1268_v11, %v1269_v12  ;;  %v2782_v18 = vsel %vm444_vm1, %v1153_v13, %v1154_v14  ;;  %v1159_v33 = vrot.slane %v2795_v30, 1  ;;  %v1274_v3 = vrot.slane %v2795_v30, 2  ;;  %v2869_v11 = vld [vmem:[#allocation3 + $0x70] sm:$0xff] }
  0x8d   : > { %630 = vrot.lane.b32.xlu1 %v615_v41, %s2344_s26  ;;  %v2807_v38 = vsel %vm444_vm1, %v1159_v33, %v1160_v34 }
  0x8e   : > { %628 = vrot.lane.b32.xlu0 %v612_v40, %s2344_s26  ;;  %s2351_s26 = smov 72  }
  0x8f   : > { %v513_v44 = vpop.permute.xlu1 %512 }
  0x90   : > { %v396_v45 = vpop.permute.xlu0 %395 }
  0x91   : > { %420 = vst.msk [vmem:[#allocation4] sm:$0xff] %vm419_vm5, %v396_v45  ;;  %664 = vrot.lane.b32.xlu1 %v340_v43, %s2345_s10  ;;  %v2819_v43 = vld [vmem:[#allocation3 + $0x60] sm:$0xff] }
  0x92   : > { %662 = vrot.lane.b32.xlu0 %v2524_v29, %s2345_s10  ;;  %v993_v29 = vld [vmem:[%s2651_s24 + $0x18] sm:$0xff]  ;;  %s2353_s24 = smov 88   ;;  %v1277_v12 = vrot.slane %v2819_v43, 2 }
  0x93   : > { %v470_v51 = vpop.permute.xlu1 %469  ;;  %1002 = vst.msk [vmem:[#allocation3 + $0x41] sm:$0xff] %vm3681_vm3, %v993_v29  ;;  %v2831_v29 = vld [vmem:[#allocation3 + $0x8] sm:$0x3] }
  0x94   : > { %v398_v50 = vpop.permute.xlu0 %397  ;;  %494 = vst.msk [vmem:[#allocation4] sm:$0xff] %vm493_vm6, %v470_v51 }
  0x95   : > { %421 = vst.msk [vmem:[#allocation4 + $0x8] sm:$0xff] %vm419_vm5, %v398_v50  ;;  %698 = vrot.lane.b32.xlu1 %v2073_v48, %s2346_s20  ;;  %v1113_v48 = vrot.slane %v2821_v46, 1 }
  0x96   : > { %696 = vrot.lane.b32.xlu0 %v2627_v23, %s2346_s20  ;;  %s2352_s20 = smov 104  }
  0x97   : > { %v472_v56 = vpop.permute.xlu1 %471 }
  0x98   : > { %v511_v55 = vpop.permute.xlu0 %510  ;;  %495 = vst.msk [vmem:[#allocation4 + $0x8] sm:$0xff] %vm493_vm6, %v472_v56  ;;  %v1145_v56 = vrot.slane %v2831_v29, 1 }
  0x99   : > { %535 = vst.msk [vmem:[#allocation4] sm:$0xff] %vm534_vm7, %v511_v55  ;;  %536 = vst.msk [vmem:[#allocation4 + $0x8] sm:$0xff] %vm534_vm7, %v513_v44  ;;  %735 = vrot.lane.b32.xlu1 %v720_v52, %s3686_s17  ;;  %v2837_v52 = vld [vmem:[#allocation3] sm:$0xff]  ;;  %v1114_v55 = vsel %vm444_vm1, %v1112_v47, %v1113_v48 }
  0x9a   : > { %733 = vrot.lane.b32.xlu0 %v2634_v24, %s3686_s17  ;;  %v1035_v21 = vld [vmem:[#allocation3 + $0x40] sm:$0xff]  ;;  %v1036_v22 = vld [vmem:[#allocation3 + $0x48] sm:$0x3]  ;;  %v1144_v54 = vrot.slane %v2837_v52, 1 }
  0x9b   : > { %v400_v5 = vpop.permute.xlu1 %399  ;;  %v1271_v23 = vrot.slane %v1035_v21, 2  ;;  %v1272_v25 = vrot.slane %v1036_v22, 2  ;;  %v1156_v31 = vrot.slane %v1035_v21, 1  ;;  %v1157_v32 = vrot.slane %v1036_v22, 1 }
  0x9c   : > { %v552_v4 = vpop.permute.xlu0 %551  ;;  %422 = vst.msk [vmem:[#allocation4 + $0x10] sm:$0xff] %vm419_vm5, %v400_v5  ;;  %v1146_v59 = vsel %vm444_vm1, %v1144_v54, %v1145_v56 }
  0x9d   : > { %576 = vst.msk [vmem:[#allocation4] sm:$0xff] %vm575_vm9, %v552_v4  ;;  %1320 = vrot.lane.b32.xlu1 %v2747_v1, %s2349_s21  ;;  %v1273_v28 = vsel %vm1234_vm8, %v1271_v23, %v1272_v25  ;;  %v1158_v37 = vsel %vm444_vm1, %v1156_v31, %v1157_v32  ;;  %v1275_v4 = vrot.slane %v2789_v27, 2  ;;  %v2881_v23 = vld [vmem:[#allocation3 + $0x18] sm:$0x3]  ;;  %v2888_v25 = vld [vmem:[#allocation3 + $0x10] sm:$0xff] }
  0x9e   : > { %1067 = vrot.lane.b32.xlu0 %v2725_v53, %s3685_s12  ;;  %v1147_v27 = vrot.slane %v2888_v25, 1 }
  0x9f   : > { %v617_v8 = vpop.permute.xlu1 %616  ;;  %v1276_v10 = vsel %vm1234_vm8, %v1274_v3, %v1275_v4  ;;  %v1044_v3 = vld [vmem:[#allocation3 + $0x88] sm:$0x3] }
  0xa0   : > { %v554_v7 = vpop.permute.xlu0 %553  ;;  %641 = vst.msk [vmem:[#allocation4] sm:$0xff] %vm640_vm10, %v617_v8  ;;  %v1040_v8 = vld [vmem:[#allocation3 + $0x68] sm:$0x3] }
  0xa1   : > { %577 = vst.msk [vmem:[#allocation4 + $0x8] sm:$0xff] %vm575_vm9, %v554_v7  ;;  %1388 = vrot.lane.b32.xlu1 %v2762_v9, %s2350_s22  ;;  %v1278_v13 = vrot.slane %v1040_v8, 2 }
  0xa2   : > { %1205 = vrot.lane.b32.xlu0 %v2760_v6, %s2345_s10 }
  0xa3   : > { %v474_v16 = vpop.permute.xlu1 %473 }
  0xa4   : > { %v402_v15 = vpop.permute.xlu0 %401  ;;  %496 = vst.msk [vmem:[#allocation4 + $0x10] sm:$0xff] %vm493_vm6, %v474_v16 }
  0xa5   : > { %423 = vst.msk [vmem:[#allocation4 + $0x18] sm:$0xff] %vm419_vm5, %v402_v15  ;;  %1322 = vrot.lane.b32.xlu1 %v2775_v17, %s2349_s21 }
  0xa6   : > { %1069 = vrot.lane.b32.xlu0 %v2762_v9, %s3685_s12 }
  0xa7   : > { %v651_v20 = vpop.permute.xlu1 %650 }
  0xa8   : > { %v619_v19 = vpop.permute.xlu0 %618  ;;  %675 = vst.msk [vmem:[#allocation4] sm:$0xff] %vm674_vm11, %v651_v20 }
  0xa9   : > { %642 = vst.msk [vmem:[#allocation4 + $0x8] sm:$0xff] %vm640_vm10, %v619_v19  ;;  %1390 = vrot.lane.b32.xlu1 %v1035_v21, %s2350_s22  ;;  %v2879_v19 = vsel %vm1234_vm8, %v1277_v12, %v1278_v13 }
  0xaa   : > { %1207 = vrot.lane.b32.xlu0 %v2782_v18, %s2345_s10 }
  0xab   : > { %v515_v24 = vpop.permute.xlu1 %514 }
  0xac   : > { %v476_v26 = vpop.permute.xlu0 %475  ;;  %537 = vst.msk [vmem:[#allocation4 + $0x10] sm:$0xff] %vm534_vm7, %v515_v24  ;;  %v1163_v24 = vrot.slane %v1040_v8, 1 }
  0xad   : > { %497 = vst.msk [vmem:[#allocation4 + $0x18] sm:$0xff] %vm493_vm6, %v476_v26  ;;  %1324 = vrot.lane.b32.xlu1 %v1273_v28, %s2349_s21  ;;  %v1162_v26 = vrot.slane %v2819_v43, 1 }
  0xae   : > { %1071 = vrot.lane.b32.xlu0 %v1035_v21, %s3685_s12 }
  0xaf   : > { %v685_v36 = vpop.permute.xlu1 %684 }
  0xb0   : > { %v653_v35 = vpop.permute.xlu0 %652  ;;  %709 = vst.msk [vmem:[#allocation4] sm:$0xff] %vm708_vm12, %v685_v36  ;;  %v1235_v36 = vrot.slane %v2734_v61, 2 }
  0xb1   : > { %676 = vst.msk [vmem:[#allocation4 + $0x8] sm:$0xff] %vm674_vm11, %v653_v35  ;;  %1602 = vrot.lane.b32.xlu1 %v1035_v21, %s2352_s20 }
  0xb2   : > { %1462 = vrot.lane.b32.xlu0 %v2782_v18, %s2351_s26 }
  0xb3   : > { %v556_v40 = vpop.permute.xlu1 %555 }
  0xb4   : > { %v517_v39 = vpop.permute.xlu0 %516  ;;  %578 = vst.msk [vmem:[#allocation4 + $0x10] sm:$0xff] %vm575_vm9, %v556_v40  ;;  %v1042_v40 = vld [vmem:[#allocation3 + $0x78] sm:$0x3] }
  0xb5   : > { %538 = vst.msk [vmem:[#allocation4 + $0x18] sm:$0xff] %vm534_vm7, %v517_v39  ;;  %1211 = vrot.lane.b32.xlu1 %v2807_v38, %s2345_s10 }
  0xb6   : > { %1209 = vrot.lane.b32.xlu0 %v1158_v37, %s2345_s10 }
  0xb7   : > { %v722_v42 = vpop.permute.xlu1 %721 }
  0xb8   : > { %v687_v41 = vpop.permute.xlu0 %686  ;;  %746 = vst.msk [vmem:[#allocation4] sm:$0xff] %vm745_vm13, %v722_v42  ;;  %v1280_v42 = vrot.slane %v2869_v11, 2 }
  0xb9   : > { %710 = vst.msk [vmem:[#allocation4 + $0x8] sm:$0xff] %vm708_vm12, %v687_v41  ;;  %1536 = vrot.lane.b32.xlu1 %v1273_v28, %s2353_s24 }
  0xba   : > { %1534 = vrot.lane.b32.xlu0 %v2775_v17, %s2353_s24 }
  0xbb   : > { %v621_v45 = vpop.permute.xlu1 %620 }
  0xbc   : > { %v558_v44 = vpop.permute.xlu0 %557  ;;  %643 = vst.msk [vmem:[#allocation4 + $0x10] sm:$0xff] %vm640_vm10, %v621_v45  ;;  %v1259_v45 = vrot.slane %v2837_v52, 2 }
  0xbd   : > { %579 = vst.msk [vmem:[#allocation4 + $0x18] sm:$0xff] %vm575_vm9, %v558_v44  ;;  %1075 = vrot.lane.b32.xlu1 %v2819_v43, %s3685_s12 }
  0xbe   : > { %1073 = vrot.lane.b32.xlu0 %v2795_v30, %s3685_s12 }
  0xbf   : > { %v623_v50 = vpop.permute.xlu1 %622  ;;  %v754_v51 = vld [vmem:[#allocation4] sm:$0xff] }
  0xc0   : > { %v724_v49 = vpop.permute.xlu0 %723  ;;  %644 = vst.msk [vmem:[#allocation4 + $0x18] sm:$0xff] %vm640_vm10, %v623_v50  ;;  %2149 = vmatprep.mubr.msk.f32.mxu0 %vm767_vm14, %v754_v51  ;;  %v1165_v50 = vrot.slane %v2869_v11, 1  ;;  %v1166_v51 = vrot.slane %v1042_v40, 1 }
  0xc1   : > { %747 = vst.msk [vmem:[#allocation4 + $0x8] sm:$0xff] %vm745_vm13, %v724_v49  ;;  %1466 = vrot.lane.b32.xlu1 %v2807_v38, %s2351_s26 }
  0xc2   : > { %1464 = vrot.lane.b32.xlu0 %v1158_v37, %s2351_s26 }
  0xc3   : > { %v657_v58 = vpop.permute.xlu1 %656 }
  0xc4   : > { %v655_v57 = vpop.permute.xlu0 %654  ;;  %678 = vst.msk [vmem:[#allocation4 + $0x18] sm:$0xff] %vm674_vm11, %v657_v58 }
  0xc5   : > { %677 = vst.msk [vmem:[#allocation4 + $0x10] sm:$0xff] %vm674_vm11, %v655_v57  ;;  %1168 = vrot.lane.b32.xlu1 %v1114_v55, %s2343_s25  ;;  %v1167_v55 = vsel %vm444_vm1, %v1165_v50, %v1166_v51 }
  0xc6   : > { %1731 = vrot.lane.b32.xlu0 %v1273_v28, %s3685_s12  ;;  %v1148_v28 = vrot.slane %v2881_v23, 1 }
  0xc7   : > { %v691_v62 = vpop.permute.xlu1 %690 }
  0xc8   : > { %v689_v60 = vpop.permute.xlu0 %688  ;;  %v755_v63 = vld [vmem:[#allocation4 + $0x8] sm:$0xff]  ;;  %712 = vst.msk [vmem:[#allocation4 + $0x18] sm:$0xff] %vm708_vm12, %v691_v62  ;;  %v2904_v33 = vsel %vm444_vm1, %v1147_v27, %v1148_v28 }
  0xc9   : > { %711 = vst.msk [vmem:[#allocation4 + $0x10] sm:$0xff] %vm708_vm12, %v689_v60  ;;  %2150 = vmatmul.mubr.msk.f32.vlgmr.msra.gmra.mrb[0].mxu0 %vm767_vm14, %v755_v63  ;;  %1201 = vrot.lane.b32.xlu1 %v1146_v59, %s2345_s10  ;;  %v1262_v59 = vrot.slane %v2888_v25, 2  ;;  %v1263_v60 = vrot.slane %v2881_v23, 2 }
  0xca   : > { %1392 = vrot.lane.b32.xlu0 %v2795_v30, %s2350_s22 }
  0xcb   : > { %v404_v2 = vpop.permute.xlu1 %403  ;;  %v1264_v4 = vsel %vm1234_vm8, %v1262_v59, %v1263_v60 }
  0xcc   : > { %v726_v0 = vpop.permute.xlu0 %725  ;;  %424 = vst.msk [vmem:[#allocation4 + $0x20] sm:$0xff] %vm419_vm5, %v404_v2  ;;  %v1043_v2 = vld [vmem:[#allocation3 + $0x80] sm:$0xff] }
  0xcd   : > { %748 = vst.msk [vmem:[#allocation4 + $0x10] sm:$0xff] %vm745_vm13, %v726_v0  ;;  %1394 = vrot.lane.b32.xlu1 %v2819_v43, %s2350_s22 }
  0xce   : > { %1676 = vrot.lane.b32.xlu0 %v1158_v37, %s2354_s23  ;;  %v1236_v37 = vrot.slane %v2821_v46, 2  ;;  %v1260_v46 = vrot.slane %v2831_v29, 2 }
  0xcf   : > { %v406_v7 = vpop.permute.xlu1 %405 }
  0xd0   : > { %v728_v5 = vpop.permute.xlu0 %727  ;;  %425 = vst.msk [vmem:[#allocation4 + $0x28] sm:$0xff] %vm419_vm5, %v406_v7  ;;  %v1237_v41 = vsel %vm1234_vm8, %v1235_v36, %v1236_v37  ;;  %v1261_v29 = vsel %vm1234_vm8, %v1259_v45, %v1260_v46  ;;  %v1423_v7 = vrot.slane %v1044_v3, 1  ;;  %v3017_v37 = vld [vmem:[#allocation3 + $0x90] sm:$0xff] }
  0xd1   : > { %749 = vst.msk [vmem:[#allocation4 + $0x18] sm:$0xff] %vm745_vm13, %v728_v5  ;;  %1678 = vrot.lane.b32.xlu1 %v2807_v38, %s2354_s23  ;;  %v1422_v5 = vrot.slane %v1043_v2, 1 }
  0xd2   : > { %1063 = vrot.lane.b32.xlu0 %v2837_v52, %s3685_s12 }
  0xd3   : > { %v480_v15 = vpop.permute.xlu1 %479  ;;  %v1424_v12 = vsel %vm444_vm1, %v1422_v5, %v1423_v7 }
  0xd4   : > { %v478_v14 = vpop.permute.xlu0 %477  ;;  %v756_v16 = vld [vmem:[#allocation4 + $0x10] sm:$0xff]  ;;  %499 = vst.msk [vmem:[#allocation4 + $0x28] sm:$0xff] %vm493_vm6, %v480_v15  ;;  %v1494_v15 = vrot.slane %v1043_v2, 2 }
  0xd5   : > { %498 = vst.msk [vmem:[#allocation4 + $0x20] sm:$0xff] %vm493_vm6, %v478_v14  ;;  %2152 = vmatprep.mubr.msk.f32.mxu0 %vm767_vm14, %v756_v16  ;;  %1077 = vrot.lane.b32.xlu1 %v2869_v11, %s3685_s12  ;;  %v1495_v16 = vrot.slane %v1044_v3, 2 }
  0xd6   : > { %1326 = vrot.lane.b32.xlu0 %v1276_v10, %s2349_s21 }
  0xd7   : > { %v521_v21 = vpop.permute.xlu1 %520 }
  0xd8   : > { %v519_v20 = vpop.permute.xlu0 %518  ;;  %v757_v22 = vld [vmem:[#allocation4 + $0x18] sm:$0xff]  ;;  %540 = vst.msk [vmem:[#allocation4 + $0x28] sm:$0xff] %vm534_vm7, %v521_v21  ;;  %v1496_v21 = vsel %vm1234_vm8, %v1494_v15, %v1495_v16 }
  0xd9   : > { %539 = vst.msk [vmem:[#allocation4 + $0x20] sm:$0xff] %vm534_vm7, %v519_v20  ;;  %2153 = vmatmul.mubr.msk.f32.gmra.mrb[2].mxu0 %vm767_vm14, %v757_v22  ;;  %1328 = vrot.lane.b32.xlu1 %v2879_v19, %s2349_s21 }
  0xda   : > { %1604 = vrot.lane.b32.xlu0 %v2795_v30, %s2352_s20  ;;  %v2901_v30 = vsel %vm444_vm1, %v1162_v26, %v1163_v24 }
  0xdb   : > { %v562_v32 = vpop.permute.xlu1 %561 }
  0xdc   : > { %v560_v31 = vpop.permute.xlu0 %559  ;;  %581 = vst.msk [vmem:[#allocation4 + $0x28] sm:$0xff] %vm575_vm9, %v562_v32 }
  0xdd   : > { %580 = vst.msk [vmem:[#allocation4 + $0x20] sm:$0xff] %vm575_vm9, %v560_v31  ;;  %1606 = vrot.lane.b32.xlu1 %v2819_v43, %s2352_s20  ;;  %v1281_v43 = vrot.slane %v1042_v40, 2 }
  0xde   : > { %1733 = vrot.lane.b32.xlu0 %v1276_v10, %s3685_s12 }
  0xdf   : > { %v627_v35 = vpop.permute.xlu1 %626  ;;  %v2929_v47 = vsel %vm1234_vm8, %v1280_v42, %v1281_v43 }
  0xe0   : > { %v625_v34 = vpop.permute.xlu0 %624  ;;  %646 = vst.msk [vmem:[#allocation4 + $0x28] sm:$0xff] %vm640_vm10, %v627_v35  ;;  %v3011_v35 = vld [vmem:[#allocation2 + $0x90] sm:$0xff] }
  0xe1   : > { %645 = vst.msk [vmem:[#allocation4 + $0x20] sm:$0xff] %vm640_vm10, %v625_v34  ;;  %1203 = vrot.lane.b32.xlu1 %v2904_v33, %s2345_s10 }
  0xe2   : > { %1213 = vrot.lane.b32.xlu0 %v2901_v30, %s2345_s10 }
  0xe3   : > { %v661_v39 = vpop.permute.xlu1 %660 }
  0xe4   : > { %v659_v38 = vpop.permute.xlu0 %658  ;;  %680 = vst.msk [vmem:[#allocation4 + $0x28] sm:$0xff] %vm674_vm11, %v661_v39 }
  0xe5   : > { %679 = vst.msk [vmem:[#allocation4 + $0x20] sm:$0xff] %vm674_vm11, %v659_v38  ;;  %1384 = vrot.lane.b32.xlu1 %v2888_v25, %s2350_s22 }
  0xe6   : > { %1538 = vrot.lane.b32.xlu0 %v1276_v10, %s2353_s24 }
  0xe7   : > { %v695_v44 = vpop.permute.xlu1 %694 }
  0xe8   : > { %v693_v61 = vpop.permute.xlu0 %692  ;;  %714 = vst.msk [vmem:[#allocation4 + $0x28] sm:$0xff] %vm708_vm12, %v695_v44 }
  0xe9   : > { %713 = vst.msk [vmem:[#allocation4 + $0x20] sm:$0xff] %vm708_vm12, %v693_v61  ;;  %1540 = vrot.lane.b32.xlu1 %v2879_v19, %s2353_s24 }
  0xea   : > { %1283 = vrot.lane.b32.xlu0 %v1237_v41, %s3686_s17 }
  0xeb   : > { %v408_v49 = vpop.permute.xlu1 %407 }
  0xec   : > { %v730_v48 = vpop.permute.xlu0 %729  ;;  %426 = vst.msk [vmem:[#allocation4 + $0x30] sm:$0xff] %vm419_vm5, %v408_v49 }
  0xed   : > { %750 = vst.msk [vmem:[#allocation4 + $0x20] sm:$0xff] %vm745_vm13, %v730_v48  ;;  %1330 = vrot.lane.b32.xlu1 %v2929_v47, %s2349_s21 }
  0xee   : > { %1065 = vrot.lane.b32.xlu0 %v2888_v25, %s3685_s12 }
  0xef   : > { %v410_v54 = vpop.permute.xlu1 %409 }
  0xf0   : > { %v732_v52 = vpop.permute.xlu0 %731  ;;  %427 = vst.msk [vmem:[#allocation4 + $0x38] sm:$0xff] %vm419_vm5, %v410_v54  ;;  %vm1340_vm5 = vcmask 392512  }
  0xf1   : > { %751 = vst.msk [vmem:[#allocation4 + $0x28] sm:$0xff] %vm745_vm13, %v732_v52  ;;  %1470 = vrot.lane.b32.xlu1 %v1167_v55, %s2351_s26 }
  0xf2   : > { %1316 = vrot.lane.b32.xlu0 %v1261_v29, %s2349_s21 }
  0xf3   : > { %v484_v57 = vpop.permute.xlu1 %483 }
  0xf4   : > { %v482_v56 = vpop.permute.xlu0 %481  ;;  %v758_v58 = vld [vmem:[#allocation4 + $0x20] sm:$0xff]  ;;  %501 = vst.msk [vmem:[#allocation4 + $0x38] sm:$0xff] %vm493_vm6, %v484_v57 }
  0xf5   : > { %500 = vst.msk [vmem:[#allocation4 + $0x30] sm:$0xff] %vm493_vm6, %v482_v56  ;;  %2155 = vmatprep.mubr.msk.f32.mxu0 %vm767_vm14, %v758_v58  ;;  %1386 = vrot.lane.b32.xlu1 %v2725_v53, %s2350_s22  ;;  %vm1793_vm6 = vcmask 130048  }
  0xf6   : > { %1468 = vrot.lane.b32.xlu0 %v2901_v30, %s2351_s26 }
  0xf7   : > { %v525_v63 = vpop.permute.xlu1 %524 }
  0xf8   : > { %v523_v62 = vpop.permute.xlu0 %522  ;;  %v759_v0 = vld [vmem:[#allocation4 + $0x28] sm:$0xff]  ;;  %542 = vst.msk [vmem:[#allocation4 + $0x38] sm:$0xff] %vm534_vm7, %v525_v63 }
  0xf9   : > { %541 = vst.msk [vmem:[#allocation4 + $0x30] sm:$0xff] %vm534_vm7, %v523_v62  ;;  %2156 = vmatmul.mubr.msk.f32.gmra.mrb[4].mxu0 %vm767_vm14, %v759_v0  ;;  %1530 = vrot.lane.b32.xlu1 %v1264_v4, %s2353_s24  ;;  %vm1374_vm7 = vcmask 458112  }
  0xfa   : > { %1735 = vrot.lane.b32.xlu0 %v2879_v19, %s3685_s12 }
  0xfb   : > { %v566_v10 = vpop.permute.xlu1 %565 }
  0xfc   : > { %v564_v8 = vpop.permute.xlu0 %563  ;;  %583 = vst.msk [vmem:[#allocation4 + $0x38] sm:$0xff] %vm575_vm9, %v566_v10 }
  0xfd   : > { %582 = vst.msk [vmem:[#allocation4 + $0x30] sm:$0xff] %vm575_vm9, %v564_v8  ;;  %1682 = vrot.lane.b32.xlu1 %v1167_v55, %s2354_s23  ;;  %v3101_v8 = vld [vmem:[%s3667_s3] ss:$0 sm:$0xff]  ;;  %vm1408_vm9 = vcmask 523712  }
  0xfe   : > { %1215 = vrot.lane.b32.xlu0 %v1167_v55, %s2345_s10  ;;  %s2355_s10 = smov 96  }
  0xff   : > { %v631_v14 = vpop.permute.xlu1 %630 }
 0x100   : > { %v629_v13 = vpop.permute.xlu0 %628  ;;  %648 = vst.msk [vmem:[#allocation4 + $0x38] sm:$0xff] %vm640_vm10, %v631_v14 }
 0x101   : > { %647 = vst.msk [vmem:[#allocation4 + $0x30] sm:$0xff] %vm640_vm10, %v629_v13  ;;  %1472 = vrot.lane.b32.xlu1 %v1424_v12, %s2351_s26  ;;  %vm1482_vm10 = vcmask 654912  }
 0x102   : > { %1396 = vrot.lane.b32.xlu0 %v2869_v11, %s2350_s22 }
 0x103   : > { %v665_v20 = vpop.permute.xlu1 %664 }
 0x104   : > { %v663_v19 = vpop.permute.xlu0 %662  ;;  %682 = vst.msk [vmem:[#allocation4 + $0x38] sm:$0xff] %vm674_vm11, %v665_v20 }
 0x105   : > { %681 = vst.msk [vmem:[#allocation4 + $0x30] sm:$0xff] %vm674_vm11, %v663_v19  ;;  %1610 = vrot.lane.b32.xlu1 %v1043_v2, %s2352_s20  ;;  %vm1554_vm11 = vcmask 786112  }
 0x106   : > { %1680 = vrot.lane.b32.xlu0 %v2901_v30, %s2354_s23 }
 0x107   : > { %v699_v23 = vpop.permute.xlu1 %698 }
 0x108   : > { %v697_v22 = vpop.permute.xlu0 %696  ;;  %716 = vst.msk [vmem:[#allocation4 + $0x38] sm:$0xff] %vm708_vm12, %v699_v23 }
 0x109   : > { %715 = vst.msk [vmem:[#allocation4 + $0x30] sm:$0xff] %vm708_vm12, %v697_v22  ;;  %1739 = vrot.lane.b32.xlu1 %v1496_v21, %s3685_s12  ;;  %vm1588_vm12 = vcmask 851712  }
 0x10a   : > { %1318 = vrot.lane.b32.xlu0 %v1264_v4, %s2349_s21  ;;  %s2359_s21 = smov 80  }
 0x10b   : > { %v736_v26 = vpop.permute.xlu1 %735 }
 0x10c   : > { %v734_v25 = vpop.permute.xlu0 %733  ;;  %753 = vst.msk [vmem:[#allocation4 + $0x38] sm:$0xff] %vm745_vm13, %v736_v26  ;;  %v1775_v26 = vld [vmem:[%s3669_s5] sm:$0xff] }
 0x10d   : > { %752 = vst.msk [vmem:[#allocation4 + $0x30] sm:$0xff] %vm745_vm13, %v734_v25  ;;  %1544 = vrot.lane.b32.xlu1 %v1496_v21, %s2353_s24  ;;  %vm1622_vm13 = vcmask 917312  }
 0x10e   : > { %1458 = vrot.lane.b32.xlu0 %v2904_v33, %s2351_s26 }
 0x110   : > { %v2985_v24 = vpop.permute.xlu0 %1067 }
 0x111   : > { %1684 = vrot.lane.b32.xlu1 %v1424_v12, %s2354_s23  ;;  %v3106_v12 = vld [vmem:[%s3668_s4] ss:$0 sm:$0xff] }
 0x112   : > { %1608 = vrot.lane.b32.xlu0 %v2869_v11, %s2352_s20  ;;  %v3001_v11 = vpop.permute.xlu1 %1320 }
 0x113   : > { %v761_v28 = vld [vmem:[#allocation4 + $0x38] sm:$0xff] }
 0x114   : > { %v760_v27 = vld [vmem:[#allocation4 + $0x30] sm:$0xff]  ;;  %v2990_v31 = vpop.permute.xlu0 %1205 }
 0x115   : > { %2158 = vmatprep.mubr.msk.f32.mxu0 %vm767_vm14, %v760_v27  ;;  %1578 = vrot.lane.b32.xlu1 %v3011_v35, %s2355_s10  ;;  %v1776_v27 = vld [vmem:[%s3669_s5 + $0x8] sm:$0xff] }
 0x116   : > { %2159 = vmatmul.mubr.msk.f32.gmra.mrb[6].mxu0 %vm767_vm14, %v761_v28  ;;  %1737 = vrot.lane.b32.xlu0 %v2929_v47, %s3685_s12  ;;  %v3007_v34 = vpop.permute.xlu1 %1388  ;;  %v3679_v28 = vmov 0.0|0.0   ;;  %vm1663_vm14 = vcmask 982912  }
 0x117   : > { %2169 = vmatprep.subr.bf16.mxu0 %v3679_v28  ;;  %2196 = vmatprep.subr.bf16.mxu1 %v3679_v28 }
 0x118   : > { %v2996_v32 = vpop.permute.xlu0 %1069 }
 0x119   : > { %1612 = vrot.lane.b32.xlu1 %v3017_v37, %s2352_s20 }
 0x11a   : > { %1398 = vrot.lane.b32.xlu0 %v1043_v2, %s2350_s22  ;;  %v3019_v38 = vpop.permute.xlu1 %1322  ;;  %s2357_s22 = smov 48  }
 0x11c   : > { %v2999_v30 = vpop.permute.xlu0 %1207 }
 0x11e   : > { %1542 = vrot.lane.b32.xlu0 %v2929_v47, %s2353_s24  ;;  %v3027_v40 = vpop.permute.xlu1 %1390 }
 0x120   : > { %v3005_v33 = vpop.permute.xlu0 %1071 }
 0x122   : > { %1460 = vrot.lane.b32.xlu0 %v2760_v6, %s2351_s26  ;;  %v3033_v42 = vpop.permute.xlu1 %1324 }
 0x124   : > { %v3015_v36 = vpop.permute.xlu0 %1462 }
 0x126   : > { %1598 = vrot.lane.b32.xlu0 %v2725_v53, %s2352_s20  ;;  %v3039_v53 = vpop.permute.xlu1 %1602 }
 0x128   : > { %v3025_v39 = vpop.permute.xlu0 %1209 }
 0x12a   : > { %1727 = vrot.lane.b32.xlu0 %v2747_v1, %s3685_s12  ;;  %v3045_v44 = vpop.permute.xlu1 %1211 }
 0x12c   : > { %v3031_v41 = vpop.permute.xlu0 %1534 }
 0x12e   : > { %1532 = vrot.lane.b32.xlu0 %v2747_v1, %s2353_s24  ;;  %v3051_v46 = vpop.permute.xlu1 %1536 }
 0x130   : > { %v3037_v43 = vpop.permute.xlu0 %1073 }
 0x132   : > { %1672 = vrot.lane.b32.xlu0 %v2760_v6, %s2354_s23  ;;  %v3055_v1 = vpop.permute.xlu1 %1075 }
 0x134   : > { %v3043_v61 = vpop.permute.xlu0 %1464 }
 0x136   : > { %1600 = vrot.lane.b32.xlu0 %v2762_v9, %s2352_s20  ;;  %v3059_v49 = vpop.permute.xlu1 %1466 }
 0x138   : > { %v3049_v45 = vpop.permute.xlu0 %1731 }
 0x13a   : > { %v1169_v50 = vpop.permute.xlu1 %1168 }
 0x13c   : > { %v3053_v47 = vpop.permute.xlu0 %1392 }
 0x13e   : > { %v1202_v51 = vpop.permute.xlu1 %1201 }
 0x140   : > { %v3057_v48 = vpop.permute.xlu0 %1676 }
 0x142   : > { %v3114_v22 = vpop.permute.xlu1 %1394 }
 0x144   : > { %v1064_v6 = vpop.permute.xlu0 %1063 }
 0x145   : > { %1088 = vst.msk [vmem:[#allocation5] sm:$0xff] %vm1087_vm0, %v1064_v6  ;;  %v2170_v6 = vpack.c.bf16 %v1776_v27, %v1775_v26  ;;  %v1779_v26 = vld [vmem:[%s3669_s5 + $0x20] sm:$0xff] }
 0x146   : > { %1193 = vst.msk [vmem:[#allocation5] sm:$0xff] %vm1192_vm15, %v1169_v50  ;;  %v3128_v50 = vpop.permute.xlu1 %1678 }
 0x147   : > { %1226 = vst.msk [vmem:[#allocation5] sm:$0xff] %vm1225_vm2, %v1202_v51  ;;  %2171 = vmatpush1.bf16.msra.mxu0 %v2170_v6  ;;  %2205 = vmatpush1.bf16.msra.mxu1 %v2170_v6  ;;  %3692 = vst [vmem:[#allocation14_spill] sm:$0xff] %v3128_v50  ;;  %v1777_v51 = vld [vmem:[%s3669_s5 + $0x10] sm:$0xff]  ;;  %v1780_v6 = vld [vmem:[%s3669_s5 + $0x28] sm:$0xff] }
 0x148   : > { %v3063_v9 = vpop.permute.xlu0 %1326  ;;  %2172 = vmatprep.subr.bf16.mxu0 %v3679_v28  ;;  %2197 = vmatprep.subr.bf16.mxu1 %v3679_v28 }
 0x14c   : > { %v3066_v29 = vpop.permute.xlu0 %1604 }
 0x150   : > { %v3068_v52 = vpop.permute.xlu0 %1733 }
 0x154   : > { %v3070_v54 = vpop.permute.xlu0 %1213 }
 0x158   : > { %v3072_v55 = vpop.permute.xlu0 %1538 }
 0x15c   : > { %v1284_v56 = vpop.permute.xlu0 %1283 }
 0x15d   : > { %1308 = vst.msk [vmem:[#allocation5] sm:$0xff] %vm1307_vm4, %v1284_v56  ;;  %v1778_v56 = vld [vmem:[%s3669_s5 + $0x18] sm:$0xff] }
 0x160   : > { %v3075_v57 = vpop.permute.xlu0 %1065 }
 0x164   : > { %v1317_v58 = vpop.permute.xlu0 %1316 }
 0x165   : > { %1341 = vst.msk [vmem:[#allocation5] sm:$0xff] %vm1340_vm5, %v1317_v58 }
 0x168   : > { %v3078_v59 = vpop.permute.xlu0 %1468 }
 0x16c   : > { %v3080_v60 = vpop.permute.xlu0 %1735 }
 0x170   : > { %v3082_v62 = vpop.permute.xlu0 %1215 }
 0x171   : > { %3687 = vst [vmem:[#allocation9_spill] sm:$0xff] %v3082_v62 }
 0x174   : > { %v3084_v63 = vpop.permute.xlu0 %1396 }
 0x175   : > { %3688 = vst [vmem:[#allocation10_spill] sm:$0xff] %v3084_v63 }
 0x178   : > { %v3086_v0 = vpop.permute.xlu0 %1680 }
 0x17c   : > { %v3088_v2 = vpop.permute.xlu0 %1318 }
 0x180   : > { %v3090_v3 = vpop.permute.xlu0 %1458 }
 0x184   : > { %v3092_v4 = vpop.permute.xlu0 %1608 }
 0x185   : > { %3689 = vst [vmem:[#allocation11_spill] sm:$0xff] %v3092_v4 }
 0x188   : > { %v3094_v5 = vpop.permute.xlu0 %1737 }
 0x18c   : > { %v3096_v7 = vpop.permute.xlu0 %1398 }
 0x18d   : > { %3690 = vst [vmem:[#allocation12_spill] sm:$0xff] %v3096_v7 }
 0x190   : > { %v3108_v13 = vpop.permute.xlu0 %1542 }
 0x191   : > { %3691 = vst [vmem:[#allocation13_spill] sm:$0xff] %v3108_v13 }
 0x194   : > { %v3116_v25 = vpop.permute.xlu0 %1460 }
 0x198   : > { %v3138_v58 = vpop.permute.xlu0 %1598 }
 0x19c   : > { %v2151_v10 = vpop.f32.mrb[0].mxu0 }
 0x19d   : > { %v909_v14 = vmul.f32 %v2151_v10, %v3101_v8  ;;  %v862_v15 = vpop.f32.mrb[1].mxu0  ;;  %v2173_v10 = vpack.c.bf16 %v1778_v56, %v1777_v51 }
 0x19e   : > { %v908_v16 = vmul.f32 %v3101_v8, %v862_v15 }
 0x19f   : > { %v924_v19 = vadd.f32 %v3106_v12, %v909_v14  ;;  %2174 = vmatpush1.bf16.msra.mxu0 %v2173_v10  ;;  %2206 = vmatpush1.bf16.msra.mxu1 %v2173_v10 }
 0x1a0   : > { %v923_v20 = vadd.f32 %v3106_v12, %v908_v16  ;;  %2175 = vmatprep.subr.bf16.mxu0 %v3679_v28  ;;  %2198 = vmatprep.subr.bf16.mxu1 %v3679_v28  ;;  %v1782_v28 = vld [vmem:[%s3669_s5 + $0x38] sm:$0xff] }
 0x1a1   : > { %v932_v21 = vmax.f32 %v924_v19, 0.0 }
 0x1a2   : > { %v931_v23 = vmax.f32 %v923_v20, 0.0 }
 0x1a3   : > { %983 = vst.msk [vmem:[#allocation2 + $0x21] sm:$0xff] %vm3681_vm3, %v932_v21 }
 0x1a4   : > { %982 = vst.msk [vmem:[#allocation2 + $0x11] sm:$0xff] %vm3681_vm3, %v931_v23 }
 0x1aa   : > { %v1011_v14 = vld [vmem:[#allocation2 + $0x20] sm:$0xff]  ;;  %v1012_v15 = vld [vmem:[#allocation2 + $0x28] sm:$0x3] }
 0x1ab   : > { %1564 = vrot.lane.b32.xlu0 %v1011_v14, %s2355_s10  ;;  %1049 = vst.msk [vmem:[#allocation5 + $0x20] sm:$0xff] %vm3681_vm3, %v1011_v14  ;;  %1352 = vrot.lane.b32.xlu1 %v1011_v14, %s2357_s22  ;;  %v1118_v16 = vrot.slane %v1011_v14, 1  ;;  %v1119_v19 = vrot.slane %v1012_v15, 1  ;;  %v3143_v20 = vld [vmem:[#allocation2 + $0x10] sm:$0xff]  ;;  %v1241_v21 = vrot.slane %v1011_v14, 2  ;;  %v1242_v23 = vrot.slane %v1012_v15, 2  ;;  %v3162_v15 = vpop.permute.xlu1 %1077 }
 0x1ac   : > { %v2154_v27 = vpop.f32.mrb[2].mxu0  ;;  %1048 = vst.msk [vmem:[#allocation5 + $0x10] sm:$0xff] %vm3681_vm3, %v3143_v20  ;;  %v1115_v13 = vrot.slane %v3143_v20, 1 }
 0x1ad   : > { %1090 = vst.msk [vmem:[#allocation5 + $0x20] sm:$0xff] %vm1087_vm0, %v2985_v24  ;;  %v911_v51 = vmul.f32 %v2154_v27, %v3101_v8  ;;  %v872_v56 = vpop.f32.mrb[3].mxu0  ;;  %v1120_v10 = vsel %vm444_vm1, %v1118_v16, %v1119_v19  ;;  %v1243_v14 = vsel %vm1234_vm8, %v1241_v21, %v1242_v23  ;;  %1089 = vst.msk [vmem:[#allocation5 + $0x10] sm:$0xff] %vm1087_vm0, %v3075_v57  ;;  %v1781_v24 = vld [vmem:[%s3669_s5 + $0x30] sm:$0xff]  ;;  %v1728_v16 = vpop.permute.xlu0 %1727 }
 0x1ae   : > { %v910_v27 = vmul.f32 %v3101_v8, %v872_v56  ;;  %1719 = vst.msk [vmem:[#allocation5 + $0x8] sm:$0xff] %vm3681_vm3, %v1243_v14  ;;  %v2176_v19 = vpack.c.bf16 %v1780_v6, %v1779_v26  ;;  %v2179_v23 = vpack.c.bf16 %v1782_v28, %v1781_v24  ;;  %v3693_v56 = vmov 0.0|0.0   ;;  %v1783_v26 = vld [vmem:[%s3669_s5 + $0x40] sm:$0xff]  ;;  %v1784_v6 = vld [vmem:[%s3669_s5 + $0x48] sm:$0xff] }
 0x1af   : > { %v926_v21 = vadd.f32 %v3106_v12, %v911_v51  ;;  %1172 = vrot.lane.b32.xlu1 %v1120_v10, %s2343_s25  ;;  %1350 = vrot.lane.b32.xlu0 %v3143_v20, %s2357_s22  ;;  %1751 = vst.msk [vmem:[#allocation5 + $0x8] sm:$0xff] %vm1087_vm0, %v1728_v16  ;;  %v3189_v28 = vpop.permute.xlu1 %1328  ;;  %v2182_v24 = vpack.c.bf16 %v1784_v6, %v1783_v26  ;;  %v1785_v16 = vld [vmem:[%s3669_s5 + $0x50] sm:$0xff] }
 0x1b0   : > { %v925_v57 = vadd.f32 %v3106_v12, %v910_v27  ;;  %2177 = vmatpush1.bf16.msra.mxu0 %v2176_v19  ;;  %2207 = vmatpush1.bf16.msra.mxu1 %v2176_v19  ;;  %v1010_v27 = vld [vmem:[#allocation2 + $0x18] sm:$0x3] }
 0x1b1   : > { %v934_v7 = vmax.f32 %v926_v21, 0.0  ;;  %2178 = vmatprep.subr.bf16.mxu0 %v3693_v56  ;;  %2199 = vmatprep.subr.bf16.mxu1 %v3693_v56  ;;  %v1786_v19 = vld [vmem:[%s3669_s5 + $0x58] sm:$0xff]  ;;  %v1239_v26 = vrot.slane %v1010_v27, 2  ;;  %v1116_v50 = vrot.slane %v1010_v27, 1  ;;  %v1789_v27 = vld [vmem:[%s3669_s5 + $0x70] sm:$0xff] }
 0x1b2   : > { %v933_v51 = vmax.f32 %v925_v57, 0.0  ;;  %v2185_v21 = vpack.c.bf16 %v1786_v19, %v1785_v16  ;;  %v1787_v19 = vld [vmem:[%s3669_s5 + $0x60] sm:$0xff] }
 0x1b3   : > { %985 = vst.msk [vmem:[#allocation2 + $0x41] sm:$0xff] %vm3681_vm3, %v934_v7  ;;  %1287 = vrot.lane.b32.xlu1 %v1243_v14, %s3686_s17  ;;  %1427 = vrot.lane.b32.xlu0 %v1120_v10, %s2358_s19  ;;  %v3202_v57 = vpop.permute.xlu1 %1606 }
 0x1b4   : > { %984 = vst.msk [vmem:[#allocation2 + $0x31] sm:$0xff] %vm3681_vm3, %v933_v51  ;;  %2180 = vmatpush1.bf16.msra.mxu0 %v2179_v23  ;;  %2208 = vmatpush1.bf16.msra.mxu1 %v2179_v23 }
 0x1b5   : > { %2181 = vmatprep.subr.bf16.mxu0 %v3693_v56  ;;  %2200 = vmatprep.subr.bf16.mxu1 %v3693_v56 }
 0x1b6   : > { %v1760_v7 = vld [vmem:[#allocation5 + $0x8] sm:$0xff] }
 0x1b7   : > { %1499 = vrot.lane.b32.xlu0 %v1243_v14, %s2359_s21  ;;  %2109 = vmatprep.mubr.msk.f32.mxu0 %vm1793_vm6, %v1760_v7  ;;  %v1238_v14 = vrot.slane %v3143_v20, 2 }
 0x1b8   : > { %2183 = vmatpush1.bf16.msra.mxu0 %v2182_v24  ;;  %2209 = vmatpush1.bf16.msra.mxu1 %v2182_v24 }
 0x1b9   : > { %2184 = vmatprep.subr.bf16.mxu0 %v3693_v56  ;;  %2201 = vmatprep.subr.bf16.mxu1 %v3693_v56  ;;  %v1240_v63 = vsel %vm1234_vm8, %v1238_v14, %v1239_v26  ;;  %v1790_v14 = vld [vmem:[%s3669_s5 + $0x78] sm:$0xff] }
 0x1ba   : > { %v3206_v23 = vld [vmem:[#allocation2 + $0x40] sm:$0xff]  ;;  %v1016_v6 = vld [vmem:[#allocation2 + $0x48] sm:$0x3]  ;;  %v2191_v26 = vpack.c.bf16 %v1790_v14, %v1789_v27 }
 0x1bb   : > { %1639 = vrot.lane.b32.xlu0 %v1120_v10, %s2360_s18  ;;  %1568 = vrot.lane.b32.xlu1 %v3206_v23, %s2355_s10  ;;  %1051 = vst.msk [vmem:[#allocation5 + $0x40] sm:$0xff] %vm3681_vm3, %v3206_v23  ;;  %v3214_v51 = vld [vmem:[#allocation2 + $0x30] sm:$0xff]  ;;  %v1247_v24 = vrot.slane %v3206_v23, 2  ;;  %v1248_v7 = vrot.slane %v1016_v6, 2  ;;  %v3221_v16 = vld [vmem:[#allocation2 + $0x38] sm:$0x3] }
 0x1bc   : > { %1092 = vst.msk [vmem:[#allocation5 + $0x40] sm:$0xff] %vm1087_vm0, %v3005_v33  ;;  %v1244_v10 = vrot.slane %v3214_v51, 2  ;;  %2186 = vmatpush1.bf16.msra.mxu0 %v2185_v21  ;;  %v1245_v4 = vrot.slane %v3221_v16, 2  ;;  %v1788_v33 = vld [vmem:[%s3669_s5 + $0x68] sm:$0xff]  ;;  %2210 = vmatpush1.bf16.msra.mxu1 %v2185_v21  ;;  %v3247_v21 = vpop.permute.xlu1 %1203  ;;  %v1121_v27 = vrot.slane %v3214_v51, 1  ;;  %v1122_v14 = vrot.slane %v3221_v16, 1 }
 0x1bd   : > { %1050 = vst.msk [vmem:[#allocation5 + $0x30] sm:$0xff] %vm3681_vm3, %v3214_v51  ;;  %v1249_v62 = vsel %vm1234_vm8, %v1247_v24, %v1248_v7  ;;  %2187 = vmatprep.subr.bf16.mxu0 %v3693_v56  ;;  %2202 = vmatprep.subr.bf16.mxu1 %v3693_v56  ;;  %v2188_v20 = vpack.c.bf16 %v1788_v33, %v1787_v19  ;;  %v1792_v24 = vld [vmem:[%s3669_s5 + $0x88] sm:$0xff] }
 0x1be   : > { %1091 = vst.msk [vmem:[#allocation5 + $0x30] sm:$0xff] %vm1087_vm0, %v2996_v32  ;;  %v3245_v32 = vsel %vm1234_vm8, %v1244_v10, %v1245_v4  ;;  %v1791_v4 = vld [vmem:[%s3669_s5 + $0x80] sm:$0xff]  ;;  %v1125_v10 = vrot.slane %v1016_v6, 1 }
 0x1bf   : > { %1721 = vst.msk [vmem:[#allocation5 + $0x28] sm:$0xff] %vm3681_vm3, %v1249_v62  ;;  %1285 = vrot.lane.b32.xlu1 %v1240_v63, %s3686_s17  ;;  %1356 = vrot.lane.b32.xlu0 %v3206_v23, %s2357_s22  ;;  %1720 = vst.msk [vmem:[#allocation5 + $0x18] sm:$0xff] %vm3681_vm3, %v3245_v32 }
 0x1c0   : > { %1753 = vst.msk [vmem:[#allocation5 + $0x28] sm:$0xff] %vm1087_vm0, %v3049_v45  ;;  %2189 = vmatpush1.bf16.msra.mxu0 %v2188_v20  ;;  %2211 = vmatpush1.bf16.msra.mxu1 %v2188_v20  ;;  %v1117_v45 = vsel %vm444_vm1, %v1115_v13, %v1116_v50  ;;  %v3268_v7 = vpop.permute.xlu1 %1384  ;;  %v2194_v13 = vpack.c.bf16 %v1792_v24, %v1791_v4  ;;  %v1124_v50 = vrot.slane %v3206_v23, 1 }
 0x1c1   : > { %2190 = vmatprep.subr.bf16.mxu0 %v3693_v56  ;;  %2203 = vmatprep.subr.bf16.mxu1 %v3693_v56 }
 0x1c2   : > { %v1126_v33 = vsel %vm444_vm1, %v1124_v50, %v1125_v10  ;;  %v3294_v50 = vsel %vm444_vm1, %v1121_v27, %v1122_v14 }
 0x1c3   : > { %1425 = vrot.lane.b32.xlu1 %v1117_v45, %s2358_s19  ;;  %1170 = vrot.lane.b32.xlu0 %v1117_v45, %s2343_s25 }
 0x1c4   : > { %2192 = vmatpush1.bf16.msra.mxu0 %v2191_v26  ;;  %2212 = vmatpush1.bf16.msra.mxu1 %v2191_v26  ;;  %v3281_v23 = vpop.permute.xlu1 %1540 }
 0x1c5   : > { %2193 = vmatprep.subr.bf16.mxu0 %v3693_v56  ;;  %2204 = vmatprep.subr.bf16.mxu1 %v3693_v56 }
 0x1c7   : > { %v1764_v19 = vld [vmem:[#allocation5 + $0x28] sm:$0xff]  ;;  %1497 = vrot.lane.b32.xlu1 %v1240_v63, %s2359_s21  ;;  %1566 = vrot.lane.b32.xlu0 %v3214_v51, %s2355_s10 }
 0x1c8   : > { %2111 = vmatprep.mubr.msk.f32.mxu1 %vm1793_vm6, %v1764_v19  ;;  %2195 = vmatpush1.bf16.msra.mxu0 %v2194_v13  ;;  %v3291_v24 = vpop.permute.xlu1 %1330 }
 0x1c9   : > { %2213 = vmatpush1.bf16.msra.mxu1 %v2194_v13 }
 0x1cb   : > { %1431 = vrot.lane.b32.xlu0 %v1126_v33, %s2358_s19  ;;  %1354 = vrot.lane.b32.xlu1 %v3214_v51, %s2357_s22 }
 0x1cc   : > { %v2157_v6 = vpop.f32.mrb[4].mxu0  ;;  %v3304_v51 = vpop.permute.xlu1 %1470 }
 0x1cd   : > { %v913_v56 = vmul.f32 %v2157_v6, %v3101_v8  ;;  %v882_v63 = vpop.f32.mrb[5].mxu0 }
 0x1ce   : > { %v912_v20 = vmul.f32 %v3101_v8, %v882_v63 }
 0x1cf   : > { %v928_v26 = vadd.f32 %v3106_v12, %v913_v56  ;;  %1503 = vrot.lane.b32.xlu0 %v1249_v62, %s2359_s21  ;;  %1176 = vrot.lane.b32.xlu1 %v1126_v33, %s2343_s25 }
 0x1d0   : > { %v927_v45 = vadd.f32 %v3106_v12, %v912_v20 }
 0x1d1   : > { %v936_v4 = vmax.f32 %v928_v26, 0.0 }
 0x1d2   : > { %v935_v13 = vmax.f32 %v927_v45, 0.0  ;;  %v3316_v45 = vpop.permute.xlu1 %1386 }
 0x1d3   : > { %987 = vst.msk [vmem:[#allocation2 + $0x61] sm:$0xff] %vm3681_vm3, %v936_v4  ;;  %1291 = vrot.lane.b32.xlu1 %v1249_v62, %s3686_s17  ;;  %1174 = vrot.lane.b32.xlu0 %v3294_v50, %s2343_s25 }
 0x1d4   : > { %986 = vst.msk [vmem:[#allocation2 + $0x51] sm:$0xff] %vm3681_vm3, %v935_v13 }
 0x1d7   : > { %1643 = vrot.lane.b32.xlu1 %v1126_v33, %s2360_s18  ;;  %1289 = vrot.lane.b32.xlu0 %v3245_v32, %s3686_s17 }
 0x1da   : > { %v1019_v16 = vld [vmem:[#allocation2 + $0x60] sm:$0xff]  ;;  %v1020_v10 = vld [vmem:[#allocation2 + $0x68] sm:$0x3] }
 0x1db   : > { %1429 = vrot.lane.b32.xlu1 %v3294_v50, %s2358_s19  ;;  %v1253_v19 = vrot.slane %v1019_v16, 2  ;;  %v1254_v6 = vrot.slane %v1020_v10, 2  ;;  %1053 = vst.msk [vmem:[#allocation5 + $0x60] sm:$0xff] %vm3681_vm3, %v1019_v16  ;;  %v1130_v62 = vrot.slane %v1019_v16, 1  ;;  %v1131_v56 = vrot.slane %v1020_v10, 1  ;;  %v1017_v63 = vld [vmem:[#allocation2 + $0x50] sm:$0xff] }
 0x1dc   : > { %1094 = vst.msk [vmem:[#allocation5 + $0x60] sm:$0xff] %vm1087_vm0, %v3055_v1  ;;  %v1018_v33 = vld [vmem:[#allocation2 + $0x58] sm:$0x3]  ;;  %v1250_v20 = vrot.slane %v1017_v63, 2  ;;  %v1127_v4 = vrot.slane %v1017_v63, 1 }
 0x1dd   : > { %1052 = vst.msk [vmem:[#allocation5 + $0x50] sm:$0xff] %vm3681_vm3, %v1017_v63  ;;  %v1255_v27 = vsel %vm1234_vm8, %v1253_v19, %v1254_v6  ;;  %v1132_v14 = vsel %vm444_vm1, %v1130_v62, %v1131_v56  ;;  %v1251_v26 = vrot.slane %v1018_v33, 2  ;;  %v1128_v13 = vrot.slane %v1018_v33, 1 }
 0x1de   : > { %1093 = vst.msk [vmem:[#allocation5 + $0x50] sm:$0xff] %vm1087_vm0, %v3037_v43  ;;  %1180 = vrot.lane.b32.xlu0 %v1132_v14, %s2343_s25  ;;  %v3330_v43 = vpop.permute.xlu1 %1530 }
 0x1df   : > { %1723 = vst.msk [vmem:[#allocation5 + $0x48] sm:$0xff] %vm3681_vm3, %v1255_v27  ;;  %1501 = vrot.lane.b32.xlu1 %v3245_v32, %s2359_s21  ;;  %v1252_v1 = vsel %vm1234_vm8, %v1250_v20, %v1251_v26  ;;  %v1129_v32 = vsel %vm444_vm1, %v1127_v4, %v1128_v13 }
 0x1e0   : > { %1755 = vst.msk [vmem:[#allocation5 + $0x48] sm:$0xff] %vm1087_vm0, %v3080_v60 }
 0x1e1   : > { %1722 = vst.msk [vmem:[#allocation5 + $0x38] sm:$0xff] %vm3681_vm3, %v1252_v1 }
 0x1e2   : > { %1754 = vst.msk [vmem:[#allocation5 + $0x38] sm:$0xff] %vm1087_vm0, %v3068_v52  ;;  %1435 = vrot.lane.b32.xlu0 %v1132_v14, %s2358_s19  ;;  %v3335_v10 = vpop.permute.xlu1 %1682 }
 0x1e3   : > { %1360 = vrot.lane.b32.xlu1 %v1019_v16, %s2357_s22 }
 0x1e6   : > { %1507 = vrot.lane.b32.xlu0 %v1255_v27, %s2359_s21  ;;  %v3345_v20 = vpop.permute.xlu1 %1472 }
 0x1e7   : > { %1572 = vrot.lane.b32.xlu1 %v1019_v16, %s2355_s10 }
 0x1e9   : > { %v2160_v60 = vpop.f32.mrb[6].mxu0 }
 0x1ea   : > { %v915_v19 = vmul.f32 %v2160_v60, %v3101_v8  ;;  %1178 = vrot.lane.b32.xlu0 %v1129_v32, %s2343_s25  ;;  %v892_v52 = vpop.f32.mrb[7].mxu0 }
 0x1eb   : > { %v914_v6 = vmul.f32 %v3101_v8, %v892_v52  ;;  %1358 = vrot.lane.b32.xlu1 %v1017_v63, %s2357_s22  ;;  %v3351_v8 = vpop.permute.xlu1 %1610 }
 0x1ec   : > { %v930_v62 = vadd.f32 %v3106_v12, %v915_v19 }
 0x1ed   : > { %v929_v56 = vadd.f32 %v3106_v12, %v914_v6 }
 0x1ee   : > { %v938_v33 = vmax.f32 %v930_v62, 0.0  ;;  %1433 = vrot.lane.b32.xlu0 %v1129_v32, %s2358_s19 }
 0x1ef   : > { %v937_v16 = vmax.f32 %v929_v56, 0.0  ;;  %1570 = vrot.lane.b32.xlu1 %v1017_v63, %s2355_s10  ;;  %v1740_v56 = vpop.permute.xlu1 %1739 }
 0x1f0   : > { %989 = vst.msk [vmem:[#allocation2 + $0x81] sm:$0xff] %vm3681_vm3, %v938_v33 }
 0x1f1   : > { %988 = vst.msk [vmem:[#allocation2 + $0x71] sm:$0xff] %vm3681_vm3, %v937_v16 }
 0x1f2   : > { %1505 = vrot.lane.b32.xlu0 %v1252_v1, %s2359_s21 }
 0x1f3   : > { %1295 = vrot.lane.b32.xlu1 %v1255_v27, %s3686_s17 }
 0x1f7   : > { %1647 = vrot.lane.b32.xlu1 %v1132_v14, %s2360_s18  ;;  %v1023_v12 = vld [vmem:[#allocation2 + $0x80] sm:$0xff]  ;;  %v1024_v26 = vld [vmem:[#allocation2 + $0x88] sm:$0x3] }
 0x1f8   : > { %1364 = vrot.lane.b32.xlu0 %v1023_v12, %s2357_s22  ;;  %v1491_v4 = vrot.slane %v1023_v12, 2  ;;  %v1021_v63 = vld [vmem:[#allocation2 + $0x70] sm:$0xff]  ;;  %v1022_v13 = vld [vmem:[#allocation2 + $0x78] sm:$0x3]  ;;  %v1492_v60 = vrot.slane %v1024_v26, 2  ;;  %v1418_v33 = vrot.slane %v1023_v12, 1 }
 0x1f9   : > { %v1256_v19 = vrot.slane %v1021_v63, 2  ;;  %v1257_v52 = vrot.slane %v1022_v13, 2  ;;  %1054 = vst.msk [vmem:[#allocation5 + $0x70] sm:$0xff] %vm3681_vm3, %v1021_v63  ;;  %v1133_v6 = vrot.slane %v1021_v63, 1  ;;  %v1134_v62 = vrot.slane %v1022_v13, 1 }
 0x1fa   : > { %1095 = vst.msk [vmem:[#allocation5 + $0x70] sm:$0xff] %vm1087_vm0, %v3162_v15  ;;  %v1493_v27 = vsel %vm1234_vm8, %v1491_v4, %v1492_v60  ;;  %v1419_v16 = vrot.slane %v1024_v26, 1 }
 0x1fb   : > { %v1258_v14 = vsel %vm1234_vm8, %v1256_v19, %v1257_v52  ;;  %1293 = vrot.lane.b32.xlu1 %v1252_v1, %s3686_s17  ;;  %1725 = vst.msk [vmem:[#allocation5 + $0x68] sm:$0xff] %vm3681_vm3, %v1493_v27  ;;  %v1135_v15 = vsel %vm444_vm1, %v1133_v6, %v1134_v62  ;;  %v3372_v1 = vpop.permute.xlu1 %1544 }
 0x1fc   : > { %1724 = vst.msk [vmem:[#allocation5 + $0x58] sm:$0xff] %vm3681_vm3, %v1258_v14  ;;  %1297 = vrot.lane.b32.xlu0 %v1258_v14, %s3686_s17  ;;  %v1420_v4 = vsel %vm444_vm1, %v1418_v33, %v1419_v16 }
 0x1fd   : > { %1757 = vst.msk [vmem:[#allocation5 + $0x68] sm:$0xff] %vm1087_vm0, %v1740_v56  ;;  %1756 = vst.msk [vmem:[#allocation5 + $0x58] sm:$0xff] %vm1087_vm0, %v3094_v5  ;;  %v3378_v5 = vpop.permute.xlu0 %1532 }
 0x1ff   : > { %1645 = vrot.lane.b32.xlu1 %v1129_v32, %s2360_s18  ;;  %v3380_v32 = vpop.permute.xlu1 %1684 }
 0x200   : > { %1437 = vrot.lane.b32.xlu0 %v1135_v15, %s2358_s19 }
 0x201   : > { %v3388_v13 = vpop.permute.xlu0 %1672 }
 0x203   : > { %1576 = vrot.lane.b32.xlu1 %v1023_v12, %s2355_s10  ;;  %v1705_v12 = vrot.slane %v3011_v35, 2 }
 0x204   : > { %1509 = vrot.lane.b32.xlu0 %v1258_v14, %s2359_s21  ;;  %v1716_v14 = vrot.slane %v3017_v37, 2 }
 0x205   : > { %v3395_v26 = vpop.permute.xlu0 %1600 }
 0x207   : > { %1362 = vrot.lane.b32.xlu1 %v1021_v63, %s2357_s22 }
 0x208   : > { %1641 = vrot.lane.b32.xlu0 %v3294_v50, %s2360_s18  ;;  %v3390_v50 = vpop.permute.xlu1 %1578 }
 0x20b   : > { %1574 = vrot.lane.b32.xlu1 %v1021_v63, %s2355_s10  ;;  %v1026_v63 = vld [vmem:[#allocation2 + $0x98] sm:$0x3] }
 0x20c   : > { %1729 = vrot.lane.b32.xlu0 %v2775_v17, %s3685_s12  ;;  %v3397_v17 = vpop.permute.xlu1 %1612  ;;  %v1706_v60 = vrot.slane %v1026_v63, 2  ;;  %v1633_v52 = vrot.slane %v1026_v63, 1 }
 0x20e   : > { %v1707_v19 = vsel %vm1234_vm8, %v1705_v12, %v1706_v60 }
 0x20f   : > { %1439 = vrot.lane.b32.xlu1 %v1420_v4, %s2358_s19  ;;  %1726 = vst.msk [vmem:[#allocation5 + $0x78] sm:$0xff] %vm3681_vm3, %v1707_v19  ;;  %vm1696_vm3 = vcmask 1048512  }
 0x210   : > { %1674 = vrot.lane.b32.xlu0 %v2782_v18, %s2354_s23  ;;  %v1632_v18 = vrot.slane %v3011_v35, 1  ;;  %v1636_v35 = vrot.slane %v3017_v37, 1 }
 0x212   : > { %v1634_v56 = vsel %vm444_vm1, %v1632_v18, %v1633_v52 }
 0x213   : > { %1511 = vrot.lane.b32.xlu1 %v1493_v27, %s2359_s21  ;;  %v1046_v27 = vld [vmem:[#allocation3 + $0x98] sm:$0x3] }
 0x214   : > { %v1717_v33 = vrot.slane %v1046_v27, 2  ;;  %v1637_v12 = vrot.slane %v1046_v27, 1 }
 0x217   : > { %1651 = vrot.lane.b32.xlu1 %v1420_v4, %s2360_s18 }
 0x21b   : > { %1182 = vrot.lane.b32.xlu1 %v1135_v15, %s2343_s25  ;;  %s311_s25 = sand.u32 1, %s2330_s28  }
 0x21c   : > { %s2061_s19 = sshll.u32 %s311_s25, 6  ;;  %s3622_s17 = scalar_lea.sflag [#allocation7], %s311_s25 }
 0x21d   : > { %v1565_v6 = vpop.permute.xlu0 %1564  ;;  %v1353_v62 = vpop.permute.xlu1 %1352  ;;  %s3593_s21 = scalar_lea.vmem [#allocation6], %s2061_s19 }
 0x21e   : > { %s1983_s26 = sshll.u32 %s3593_s21, 4  ;;  %s3616_s26 = int_to_ptr.vmem [resolvable:$true] %s1983_s26 }
 0x21f   : > { %1649 = vrot.lane.b32.xlu1 %v1135_v15, %s2360_s18  ;;  %v1718_v15 = vsel %vm1234_vm8, %v1716_v14, %v1717_v33  ;;  %vm1449_vm8 = vcmask 589312  }
 0x221   : > { %v1173_v16 = vpop.permute.xlu1 %1172  ;;  %v1351_v4 = vpop.permute.xlu0 %1350 }
 0x222   : > { %1195 = vst.msk [vmem:[#allocation5 + $0x20] sm:$0xff] %vm1192_vm15, %v1173_v16  ;;  %v3695_v16 = vld [vmem:[#allocation10_spill] sm:$0xff] }
 0x223   : > { %1375 = vst.msk [vmem:[#allocation5] sm:$0xff] %vm1374_vm7, %v1351_v4  ;;  %1653 = vrot.lane.b32.xlu1 %v1634_v56, %s2360_s18  ;;  %s2125_s18 = sshll.u32 %s2429_s9, 10  ;;  %s2361_s9 = smov [#allocation6]  }
 0x224   : > { %1228 = vst.msk [vmem:[#allocation5 + $0x20] sm:$0xff] %vm1225_vm2, %v2990_v31  ;;  %v1638_v31 = vsel %vm444_vm1, %v1636_v35, %v1637_v12  ;;  %vm1521_vm1 = vcmask 720512   ;;  %v3697_v12 = vld [vmem:[#allocation11_spill] sm:$0xff]  ;;  %s3614_s13 = scalar_lea.hbm %s3672_s8, %s2125_s18  ;;  %s2280_s10 = sshll.u32 %s2361_s9, 4  ;;  %s2281_s10 = int_to_ptr.vmem [resolvable:$false] %s2280_s10 }
 0x225   : > { %1409 = vst.msk [vmem:[#allocation5] sm:$0xff] %vm1408_vm9, %v3268_v7  ;;  %v1288_v63 = vpop.permute.xlu1 %1287  ;;  %v1428_v60 = vpop.permute.xlu0 %1427  ;;  %s2282_s22 = scalar_lea.vmem %s2281_s10, 2048  ;;  %p2283_p0 = scmp.lt.s32.totalorder %s3616_s26, %s2281_s10 }
 0x226   : > { %1310 = vst.msk [vmem:[#allocation5 + $0x20] sm:$0xff] %vm1307_vm4, %v1288_v63  ;;  %v1770_v63 = vld [vmem:[#allocation5 + $0x58] sm:$0xff] }
 0x227   : > { %1343 = vst.msk [vmem:[#allocation5 + $0x20] sm:$0xff] %vm1340_vm5, %v3001_v11  ;;  %1741 = vrot.lane.b32.xlu1 %v1718_v15, %s3685_s12  ;;  %v3696_v15 = vld [vmem:[#allocation13_spill] sm:$0xff] }
 0x229   : > { %v1500_v19 = vpop.permute.xlu0 %1499 }
 0x22b   : > { %1686 = vrot.lane.b32.xlu1 %v1638_v31, %s2354_s23  ;;  %s2276_s23 = scalar_lea.vmem %s3616_s26, 1024 }
 0x22c   : > { %p2277_p11 = scmp.ne.s32.totalorder %s3616_s26, %s2276_s23  ;;  %p2284_p1 = scmp.lt.s32.totalorder %s2282_s22, %s2276_s23 }
 0x22d   : > { %v1640_v7 = vpop.permute.xlu0 %1639  ;;  %v3421_v18 = vpop.permute.xlu1 %1568 }
 0x22e   : > { %p2278_p12 = pnand %p2277_p11, %p2446_p5  ;;  %p2285_p2 = por %p2284_p1, %p2283_p0 }
 0x230   : > { %p2279_p13 = pneg %p2278_p12 }
 0x231   : > { %v1286_v37 = vpop.permute.xlu1 %1285  ;;  %v1357_v52 = vpop.permute.xlu0 %1356 }
 0x232   : > { %p2286_p3 = pnand %p2285_p2, %p2279_p13 }
 0x235   : > { %v1426_v27 = vpop.permute.xlu1 %1425  ;;  %v1171_v14 = vpop.permute.xlu0 %1170 }
 0x236   : > { %1450 = vst.msk [vmem:[#allocation5] sm:$0xff] %vm1449_vm8, %v1426_v27  ;;  %v3699_v27 = vld [vmem:[#allocation12_spill] sm:$0xff] }
 0x237   : > { %1194 = vst.msk [vmem:[#allocation5 + $0x10] sm:$0xff] %vm1192_vm15, %v1171_v14 }
 0x238   : > { %1227 = vst.msk [vmem:[#allocation5 + $0x10] sm:$0xff] %vm1225_vm2, %v3247_v21 }
 0x239   : > { %1483 = vst.msk [vmem:[#allocation5] sm:$0xff] %vm1482_vm10, %v3090_v3  ;;  %v1498_v11 = vpop.permute.xlu1 %1497  ;;  %v1567_v56 = vpop.permute.xlu0 %1566 }
 0x23a   : > { %1309 = vst.msk [vmem:[#allocation5 + $0x10] sm:$0xff] %vm1307_vm4, %v1286_v37 }
 0x23b   : > { %1342 = vst.msk [vmem:[#allocation5 + $0x10] sm:$0xff] %vm1340_vm5, %v3088_v2 }
 0x23c   : > { %1376 = vst.msk [vmem:[#allocation5 + $0x10] sm:$0xff] %vm1374_vm7, %v1353_v62 }
 0x23d   : > { %1522 = vst.msk [vmem:[#allocation5] sm:$0xff] %vm1521_vm1, %v1498_v11  ;;  %v1432_v2 = vpop.permute.xlu0 %1431  ;;  %v1355_v3 = vpop.permute.xlu1 %1354  ;;  %v2117_v11 = vld [vmem:[%s3670_s6] ss:$0 sm:$0xff] }
 0x23e   : > { %1410 = vst.msk [vmem:[#allocation5 + $0x10] sm:$0xff] %vm1408_vm9, %v3316_v45 }
 0x23f   : > { %1555 = vst.msk [vmem:[#allocation5] sm:$0xff] %vm1554_vm11, %v3330_v43 }
 0x240   : > { %1451 = vst.msk [vmem:[#allocation5 + $0x10] sm:$0xff] %vm1449_vm8, %v1428_v60 }
 0x241   : > { %1589 = vst.msk [vmem:[#allocation5] sm:$0xff] %vm1588_vm12, %v1565_v6 }
 0x242   : > { %1623 = vst.msk [vmem:[#allocation5] sm:$0xff] %vm1622_vm13, %v3138_v58  ;;  %v1177_v58 = vpop.permute.xlu1 %1176 }
 0x243   : > { %1484 = vst.msk [vmem:[#allocation5 + $0x10] sm:$0xff] %vm1482_vm10, %v3116_v25  ;;  %v1504_v25 = vpop.permute.xlu0 %1503 }
 0x244   : > { %1664 = vst.msk [vmem:[#allocation5] sm:$0xff] %vm1663_vm14, %v1640_v7 }
 0x245   : > { %1523 = vst.msk [vmem:[#allocation5 + $0x10] sm:$0xff] %vm1521_vm1, %v1500_v19 }
 0x246   : > { %1377 = vst.msk [vmem:[#allocation5 + $0x20] sm:$0xff] %vm1374_vm7, %v1355_v3  ;;  %v1292_v21 = vpop.permute.xlu1 %1291 }
 0x247   : > { %1697 = vst.msk [vmem:[#allocation5] sm:$0xff] %vm1696_vm3, %v3388_v13  ;;  %v1175_v45 = vpop.permute.xlu0 %1174 }
 0x248   : > { %1556 = vst.msk [vmem:[#allocation5 + $0x10] sm:$0xff] %vm1554_vm11, %v3378_v5 }
 0x249   : > { %1411 = vst.msk [vmem:[#allocation5 + $0x20] sm:$0xff] %vm1408_vm9, %v3007_v34 }
 0x24a   : > { %1590 = vst.msk [vmem:[#allocation5 + $0x10] sm:$0xff] %vm1588_vm12, %v1567_v56  ;;  %v1644_v34 = vpop.permute.xlu1 %1643 }
 0x24b   : > { %1624 = vst.msk [vmem:[#allocation5 + $0x10] sm:$0xff] %vm1622_vm13, %v3395_v26  ;;  %v1290_v5 = vpop.permute.xlu0 %1289 }
 0x24c   : > { %1197 = vst.msk [vmem:[#allocation5 + $0x40] sm:$0xff] %vm1192_vm15, %v1177_v58  ;;  %1196 = vst.msk [vmem:[#allocation5 + $0x30] sm:$0xff] %vm1192_vm15, %v1175_v45 }
 0x24d   : > { %1230 = vst.msk [vmem:[#allocation5 + $0x40] sm:$0xff] %vm1225_vm2, %v3025_v39  ;;  %1229 = vst.msk [vmem:[#allocation5 + $0x30] sm:$0xff] %vm1225_vm2, %v2999_v30 }
 0x24e   : > { %1312 = vst.msk [vmem:[#allocation5 + $0x40] sm:$0xff] %vm1307_vm4, %v1292_v21  ;;  %v1759_v43 = vld [vmem:[#allocation5] sm:$0xff]  ;;  %1311 = vst.msk [vmem:[#allocation5 + $0x30] sm:$0xff] %vm1307_vm4, %v1290_v5  ;;  %v1430_v39 = vpop.permute.xlu1 %1429 }
 0x24f   : > { %1345 = vst.msk [vmem:[#allocation5 + $0x40] sm:$0xff] %vm1340_vm5, %v3033_v42  ;;  %1883 = vmatmul.mubr.f32.vlgmr.msra.gmra.mrb[8].mxu0 %v1759_v43  ;;  %1344 = vst.msk [vmem:[#allocation5 + $0x30] sm:$0xff] %vm1340_vm5, %v3019_v38 }
 0x250   : > { %1378 = vst.msk [vmem:[#allocation5 + $0x30] sm:$0xff] %vm1374_vm7, %v1357_v52  ;;  %v1181_v30 = vpop.permute.xlu0 %1180 }
 0x251   : > { %1412 = vst.msk [vmem:[#allocation5 + $0x30] sm:$0xff] %vm1408_vm9, %v3027_v40 }
 0x252   : > { %1453 = vst.msk [vmem:[#allocation5 + $0x30] sm:$0xff] %vm1449_vm8, %v1432_v2  ;;  %1452 = vst.msk [vmem:[#allocation5 + $0x20] sm:$0xff] %vm1449_vm8, %v1430_v39  ;;  %v1502_v38 = vpop.permute.xlu1 %1501  ;;  %v2118_v2 = vld [vmem:[%s3671_s7] ss:$0 sm:$0xff] }
 0x253   : > { %1486 = vst.msk [vmem:[#allocation5 + $0x30] sm:$0xff] %vm1482_vm10, %v3043_v61  ;;  %1485 = vst.msk [vmem:[#allocation5 + $0x20] sm:$0xff] %vm1482_vm10, %v3015_v36 }
 0x254   : > { %1525 = vst.msk [vmem:[#allocation5 + $0x30] sm:$0xff] %vm1521_vm1, %v1504_v25  ;;  %1524 = vst.msk [vmem:[#allocation5 + $0x20] sm:$0xff] %vm1521_vm1, %v1502_v38  ;;  %v1436_v36 = vpop.permute.xlu0 %1435 }
 0x255   : > { %1558 = vst.msk [vmem:[#allocation5 + $0x30] sm:$0xff] %vm1554_vm11, %v3051_v46  ;;  %1557 = vst.msk [vmem:[#allocation5 + $0x20] sm:$0xff] %vm1554_vm11, %v3031_v41 }
 0x256   : > { %1199 = vst.msk [vmem:[#allocation5 + $0x60] sm:$0xff] %vm1192_vm15, %v1181_v30  ;;  %v1361_v40 = vpop.permute.xlu1 %1360 }
 0x257   : > { %1232 = vst.msk [vmem:[#allocation5 + $0x60] sm:$0xff] %vm1225_vm2, %v3070_v54 }
 0x258   : > { %1591 = vst.msk [vmem:[#allocation5 + $0x20] sm:$0xff] %vm1588_vm12, %v3421_v18  ;;  %v1508_v42 = vpop.permute.xlu0 %1507 }
 0x259   : > { %1625 = vst.msk [vmem:[#allocation5 + $0x20] sm:$0xff] %vm1622_vm13, %v3039_v53  ;;  %v1766_v53 = vld [vmem:[#allocation5 + $0x38] sm:$0xff] }
 0x25a   : > { %1666 = vst.msk [vmem:[#allocation5 + $0x20] sm:$0xff] %vm1663_vm14, %v1644_v34  ;;  %v1573_v61 = vpop.permute.xlu1 %1572 }
 0x25b   : > { %1699 = vst.msk [vmem:[#allocation5 + $0x20] sm:$0xff] %vm1696_vm3, %v3057_v48 }
 0x25c   : > { %v1179_v46 = vpop.permute.xlu0 %1178 }
 0x25d   : > { %1198 = vst.msk [vmem:[#allocation5 + $0x50] sm:$0xff] %vm1192_vm15, %v1179_v46 }
 0x25e   : > { %v1359_v54 = vpop.permute.xlu1 %1358  ;;  %1231 = vst.msk [vmem:[#allocation5 + $0x50] sm:$0xff] %vm1225_vm2, %v3045_v44 }
 0x25f   : > { %1379 = vst.msk [vmem:[#allocation5 + $0x40] sm:$0xff] %vm1374_vm7, %v1359_v54 }
 0x260   : > { %1413 = vst.msk [vmem:[#allocation5 + $0x40] sm:$0xff] %vm1408_vm9, %v3053_v47  ;;  %v1434_v48 = vpop.permute.xlu0 %1433 }
 0x261   : > { %1454 = vst.msk [vmem:[#allocation5 + $0x40] sm:$0xff] %vm1449_vm8, %v1434_v48 }
 0x262   : > { %v1763_v41 = vld [vmem:[#allocation5 + $0x20] sm:$0xff]  ;;  %v1571_v13 = vpop.permute.xlu1 %1570  ;;  %1487 = vst.msk [vmem:[#allocation5 + $0x40] sm:$0xff] %vm1482_vm10, %v3059_v49 }
 0x263   : > { %1893 = vmatmul.mubr.f32.vlgmr.msra.gmra.mrb[0].mxu1 %v1763_v41  ;;  %1592 = vst.msk [vmem:[#allocation5 + $0x30] sm:$0xff] %vm1588_vm12, %v1571_v13 }
 0x264   : > { %2112 = vmatprep.mubr.msk.f32.mxu1 %vm1793_vm6, %v1766_v53  ;;  %1626 = vst.msk [vmem:[#allocation5 + $0x30] sm:$0xff] %vm1622_vm13, %v3066_v29  ;;  %v1506_v44 = vpop.permute.xlu0 %1505 }
 0x265   : > { %1526 = vst.msk [vmem:[#allocation5 + $0x40] sm:$0xff] %vm1521_vm1, %v1506_v44 }
 0x266   : > { %v1296_v47 = vpop.permute.xlu1 %1295  ;;  %1559 = vst.msk [vmem:[#allocation5 + $0x40] sm:$0xff] %vm1554_vm11, %v3072_v55 }
 0x267   : > { %1314 = vst.msk [vmem:[#allocation5 + $0x60] sm:$0xff] %vm1307_vm4, %v1296_v47 }
 0x268   : > { %1593 = vst.msk [vmem:[#allocation5 + $0x40] sm:$0xff] %vm1588_vm12, %v1573_v61 }
 0x269   : > { %1347 = vst.msk [vmem:[#allocation5 + $0x60] sm:$0xff] %vm1340_vm5, %v3189_v28 }
 0x26a   : > { %1627 = vst.msk [vmem:[#allocation5 + $0x40] sm:$0xff] %vm1622_vm13, %v3202_v57  ;;  %v1648_v49 = vpop.permute.xlu1 %1647  ;;  %v1365_v29 = vpop.permute.xlu0 %1364 }
 0x26b   : > { %1668 = vst.msk [vmem:[#allocation5 + $0x40] sm:$0xff] %vm1663_vm14, %v1648_v49 }
 0x26c   : > { %1701 = vst.msk [vmem:[#allocation5 + $0x40] sm:$0xff] %vm1696_vm3, %v3086_v0  ;;  %v3694_v0 = vld [vmem:[#allocation14_spill] sm:$0xff] }
 0x26e   : > { %v1294_v26 = vpop.permute.xlu1 %1293  ;;  %v1298_v55 = vpop.permute.xlu0 %1297 }
 0x26f   : > { %1313 = vst.msk [vmem:[#allocation5 + $0x50] sm:$0xff] %vm1307_vm4, %v1294_v26 }
 0x270   : > { %1346 = vst.msk [vmem:[#allocation5 + $0x50] sm:$0xff] %vm1340_vm5, %v3063_v9 }
 0x271   : > { %1380 = vst.msk [vmem:[#allocation5 + $0x50] sm:$0xff] %vm1374_vm7, %v1361_v40 }
 0x272   : > { %1414 = vst.msk [vmem:[#allocation5 + $0x50] sm:$0xff] %vm1408_vm9, %v3114_v22  ;;  %v1646_v28 = vpop.permute.xlu1 %1645  ;;  %v1438_v57 = vpop.permute.xlu0 %1437 }
 0x273   : > { %1455 = vst.msk [vmem:[#allocation5 + $0x50] sm:$0xff] %vm1449_vm8, %v1436_v36  ;;  %v1767_v4 = vld [vmem:[#allocation5 + $0x40] sm:$0xff] }
 0x274   : > { %1667 = vst.msk [vmem:[#allocation5 + $0x30] sm:$0xff] %vm1663_vm14, %v1646_v28 }
 0x275   : > { %1488 = vst.msk [vmem:[#allocation5 + $0x50] sm:$0xff] %vm1482_vm10, %v3078_v59  ;;  %v1768_v59 = vld [vmem:[#allocation5 + $0x48] sm:$0xff] }
 0x276   : > { %1700 = vst.msk [vmem:[#allocation5 + $0x30] sm:$0xff] %vm1696_vm3, %v3694_v0  ;;  %v1577_v9 = vpop.permute.xlu1 %1576  ;;  %v1510_v6 = vpop.permute.xlu0 %1509 }
 0x277   : > { %1527 = vst.msk [vmem:[#allocation5 + $0x50] sm:$0xff] %vm1521_vm1, %v1508_v42 }
 0x278   : > { %1560 = vst.msk [vmem:[#allocation5 + $0x50] sm:$0xff] %vm1554_vm11, %v3281_v23 }
 0x27a   : > { %v1363_v22 = vpop.permute.xlu1 %1362  ;;  %v1642_v62 = vpop.permute.xlu0 %1641 }
 0x27b   : > { %1381 = vst.msk [vmem:[#allocation5 + $0x60] sm:$0xff] %vm1374_vm7, %v1363_v22 }
 0x27c   : > { %1415 = vst.msk [vmem:[#allocation5 + $0x60] sm:$0xff] %vm1408_vm9, %v3695_v16 }
 0x27d   : > { %v1765_v33 = vld [vmem:[#allocation5 + $0x30] sm:$0xff]  ;;  %1665 = vst.msk [vmem:[#allocation5 + $0x10] sm:$0xff] %vm1663_vm14, %v1642_v62 }
 0x27e   : > { %1898 = vmatmul.mubr.f32.gmra.mrb[2].mxu1 %v1765_v33  ;;  %1456 = vst.msk [vmem:[#allocation5 + $0x60] sm:$0xff] %vm1449_vm8, %v1438_v57  ;;  %v1575_v23 = vpop.permute.xlu1 %1574  ;;  %v1730_v35 = vpop.permute.xlu0 %1729 }
 0x27f   : > { %2113 = vmatprep.mubr.msk.f32.mxu1 %vm1793_vm6, %v1768_v59  ;;  %1489 = vst.msk [vmem:[#allocation5 + $0x60] sm:$0xff] %vm1482_vm10, %v3304_v51 }
 0x280   : > { %1528 = vst.msk [vmem:[#allocation5 + $0x60] sm:$0xff] %vm1521_vm1, %v1510_v6 }
 0x281   : > { %1594 = vst.msk [vmem:[#allocation5 + $0x50] sm:$0xff] %vm1588_vm12, %v1575_v23 }
 0x282   : > { %1561 = vst.msk [vmem:[#allocation5 + $0x60] sm:$0xff] %vm1554_vm11, %v3696_v15  ;;  %1903 = vmatmul.mubr.f32.gmra.mrb[4].mxu1 %v1767_v4  ;;  %v1440_v51 = vpop.permute.xlu1 %1439  ;;  %v1675_v60 = vpop.permute.xlu0 %1674 }
 0x283   : > { %1628 = vst.msk [vmem:[#allocation5 + $0x50] sm:$0xff] %vm1622_vm13, %v3697_v12  ;;  %2114 = vmatprep.mubr.msk.f32.mxu1 %vm1793_vm6, %v1770_v63 }
 0x284   : > { %1752 = vst.msk [vmem:[#allocation5 + $0x18] sm:$0xff] %vm1087_vm0, %v1730_v35 }
 0x285   : > { %1595 = vst.msk [vmem:[#allocation5 + $0x60] sm:$0xff] %vm1588_vm12, %v1577_v9 }
 0x286   : > { %1629 = vst.msk [vmem:[#allocation5 + $0x60] sm:$0xff] %vm1622_vm13, %v3351_v8  ;;  %v1512_v31 = vpop.permute.xlu1 %1511  ;;  %v3698_v8 = vld [vmem:[#allocation9_spill] sm:$0xff] }
 0x287   : > { %1698 = vst.msk [vmem:[#allocation5 + $0x10] sm:$0xff] %vm1696_vm3, %v1675_v60 }
 0x28a   : > { %v1652_v7 = vpop.permute.xlu1 %1651 }
 0x28b   : > { %v1762_v19 = vld [vmem:[#allocation5 + $0x18] sm:$0xff]  ;;  %1670 = vst.msk [vmem:[#allocation5 + $0x60] sm:$0xff] %vm1663_vm14, %v1652_v7 }
 0x28c   : > { %2110 = vmatprep.mubr.msk.f32.mxu0 %vm1793_vm6, %v1762_v19  ;;  %1703 = vst.msk [vmem:[#allocation5 + $0x60] sm:$0xff] %vm1696_vm3, %v3380_v32 }
 0x28e   : > { %v1761_v18 = vld [vmem:[#allocation5 + $0x10] sm:$0xff]  ;;  %v1183_v37 = vpop.permute.xlu1 %1182 }
 0x28f   : > { %1888 = vmatmul.mubr.f32.gmra.mrb[10].mxu0 %v1761_v18  ;;  %1200 = vst.msk [vmem:[#allocation5 + $0x70] sm:$0xff] %vm1192_vm15, %v1183_v37 }
 0x290   : > { %1233 = vst.msk [vmem:[#allocation5 + $0x70] sm:$0xff] %vm1225_vm2, %v3698_v8 }
 0x291   : > { %1315 = vst.msk [vmem:[#allocation5 + $0x70] sm:$0xff] %vm1307_vm4, %v1298_v55 }
 0x292   : > { %1348 = vst.msk [vmem:[#allocation5 + $0x70] sm:$0xff] %vm1340_vm5, %v3291_v24  ;;  %v1650_v52 = vpop.permute.xlu1 %1649 }
 0x293   : > { %1382 = vst.msk [vmem:[#allocation5 + $0x70] sm:$0xff] %vm1374_vm7, %v1365_v29 }
 0x294   : > { %1669 = vst.msk [vmem:[#allocation5 + $0x50] sm:$0xff] %vm1663_vm14, %v1650_v52 }
 0x295   : > { %1416 = vst.msk [vmem:[#allocation5 + $0x70] sm:$0xff] %vm1408_vm9, %v3699_v27 }
 0x296   : > { %1702 = vst.msk [vmem:[#allocation5 + $0x50] sm:$0xff] %vm1696_vm3, %v3335_v10  ;;  %v1654_v32 = vpop.permute.xlu1 %1653 }
 0x297   : > { %1457 = vst.msk [vmem:[#allocation5 + $0x70] sm:$0xff] %vm1449_vm8, %v1440_v51 }
 0x298   : > { %1490 = vst.msk [vmem:[#allocation5 + $0x70] sm:$0xff] %vm1482_vm10, %v3345_v20  ;;  %v1772_v20 = vld [vmem:[#allocation5 + $0x68] sm:$0xff] }
 0x299   : > { %1529 = vst.msk [vmem:[#allocation5 + $0x70] sm:$0xff] %vm1521_vm1, %v1512_v31 }
 0x29a   : > { %1562 = vst.msk [vmem:[#allocation5 + $0x70] sm:$0xff] %vm1554_vm11, %v3372_v1  ;;  %v1742_v24 = vpop.permute.xlu1 %1741  ;;  %v1771_v1 = vld [vmem:[#allocation5 + $0x60] sm:$0xff] }
 0x29b   : > { %1596 = vst.msk [vmem:[#allocation5 + $0x70] sm:$0xff] %vm1588_vm12, %v3390_v50 }
 0x29c   : > { %1630 = vst.msk [vmem:[#allocation5 + $0x70] sm:$0xff] %vm1622_vm13, %v3397_v17 }
 0x29d   : > { %1671 = vst.msk [vmem:[#allocation5 + $0x70] sm:$0xff] %vm1663_vm14, %v1654_v32  ;;  %v1769_v10 = vld [vmem:[#allocation5 + $0x50] sm:$0xff] }
 0x29e   : > { %1758 = vst.msk [vmem:[#allocation5 + $0x78] sm:$0xff] %vm1087_vm0, %v1742_v24  ;;  %1908 = vmatmul.mubr.f32.gmra.mrb[6].mxu1 %v1769_v10  ;;  %v1687_v14 = vpop.permute.xlu1 %1686 }
 0x29f   : > { %2115 = vmatprep.mubr.msk.f32.mxu1 %vm1793_vm6, %v1772_v20  ;;  %1704 = vst.msk [vmem:[#allocation5 + $0x70] sm:$0xff] %vm1696_vm3, %v1687_v14  ;;  %vm3700_vm3 = vcmask 64512  }
 0x2a0   : > { %vm3701_vm15 = vmmov %vm3700_vm3 }
 0x2a1   : > { %vm3702_vm0 = vmmov %vm3700_vm3 }
 0x2a2   : > { %1913 = vmatmul.mubr.f32.gmra.mrb[8].mxu1 %v1771_v1  ;;  %vm3703_vm2 = vmmov %vm3702_vm0 }
 0x2a3   : > { %vm3704_vm4 = vmmov %vm3702_vm0 }
 0x2a4   : > { %vm3705_vm5 = vmmov %vm3702_vm0 }
 0x2a5   : > { %v1774_v50 = vld [vmem:[#allocation5 + $0x78] sm:$0xff]  ;;  %vm3707_vm7 = vmmov %vm3702_vm0 }
 0x2a6   : > { %2116 = vmatprep.mubr.msk.f32.mxu1 %vm1793_vm6, %v1774_v50  ;;  %v1773_v17 = vld [vmem:[#allocation5 + $0x70] sm:$0xff]  ;;  %vm3706_vm6 = vmmov %vm3702_vm0 }
 0x2a7   : > { %1918 = vmatmul.mubr.f32.gmra.mrb[10].mxu1 %v1773_v17 }
 0x322   : > { %v1884_v56 = vpop.f32.mrb[8].mxu0 }
 0x323   : > { %v1930_v3 = vmul.f32 %v2117_v11, %v1884_v56  ;;  %v1886_v25 = vpop.f32.mrb[9].mxu0 }
 0x325   : > { %v1945_v58 = vadd.f32 %v2118_v2, %v1930_v3 }
 0x327   : > { %v1953_v21 = vmax.f32 %v1945_v58, 0.0 }
 0x329   : > { %1961 = vst.msk [vmem:[%s3593_s21] sm:$0xff] %vm3700_vm3, %v1953_v21 }
 0x336   : > { %v1894_v45 = vpop.f32.mrb[0].mxu1 }
 0x337   : > { %v1932_v43 = vmul.f32 %v2117_v11, %v1894_v45  ;;  %v1896_v34 = vpop.f32.mrb[1].mxu1 }
 0x339   : > { %v1947_v5 = vadd.f32 %v2118_v2, %v1932_v43 }
 0x33b   : > { %v1955_v39 = vmax.f32 %v1947_v5, 0.0 }
 0x33d   : > { %1963 = vst.msk [vmem:[%s3593_s21 + $0x10] sm:$0xff] %vm3701_vm15, %v1955_v39 }
 0x351   : > { %v1899_v30 = vpop.f32.mrb[2].mxu1 }
 0x352   : > { %v1933_v38 = vmul.f32 %v2117_v11, %v1899_v30  ;;  %v1901_v36 = vpop.f32.mrb[3].mxu1 }
 0x354   : > { %v1948_v40 = vadd.f32 %v2118_v2, %v1933_v38 }
 0x355   : > { %v1904_v42 = vpop.f32.mrb[4].mxu1 }
 0x356   : > { %v1956_v61 = vmax.f32 %v1948_v40, 0.0  ;;  %v1934_v46 = vmul.f32 %v2117_v11, %v1904_v42  ;;  %v1906_v54 = vpop.f32.mrb[5].mxu1 }
 0x358   : > { %1964 = vst.msk [vmem:[%s3593_s21 + $0x18] sm:$0xff] %vm3702_vm0, %v1956_v61  ;;  %v1949_v41 = vadd.f32 %v2118_v2, %v1934_v46 }
 0x35a   : > { %v1957_v53 = vmax.f32 %v1949_v41, 0.0 }
 0x35c   : > { %1965 = vst.msk [vmem:[%s3593_s21 + $0x20] sm:$0xff] %vm3703_vm2, %v1957_v53 }
 0x362   : > { %v1889_v48 = vpop.f32.mrb[10].mxu0 }
 0x363   : > { %v1931_v13 = vmul.f32 %v2117_v11, %v1889_v48  ;;  %v1891_v44 = vpop.f32.mrb[11].mxu0 }
 0x365   : > { %v1946_v47 = vadd.f32 %v2118_v2, %v1931_v13 }
 0x367   : > { %v1954_v49 = vmax.f32 %v1946_v47, 0.0 }
 0x369   : > { %1962 = vst.msk [vmem:[%s3593_s21 + $0x8] sm:$0xff] %vm3704_vm4, %v1954_v49 }
 0x371   : > { %v1909_v29 = vpop.f32.mrb[6].mxu1 }
 0x372   : > { %v1935_v26 = vmul.f32 %v2117_v11, %v1909_v29  ;;  %v1911_v55 = vpop.f32.mrb[7].mxu1 }
 0x374   : > { %v1950_v28 = vadd.f32 %v2118_v2, %v1935_v26 }
 0x375   : > { %v1914_v57 = vpop.f32.mrb[8].mxu1 }
 0x376   : > { %v1958_v0 = vmax.f32 %v1950_v28, 0.0  ;;  %v1936_v9 = vmul.f32 %v2117_v11, %v1914_v57  ;;  %v1916_v6 = vpop.f32.mrb[9].mxu1 }
 0x378   : > { %1966 = vst.msk [vmem:[%s3593_s21 + $0x28] sm:$0xff] %vm3705_vm5, %v1958_v0  ;;  %v1951_v22 = vadd.f32 %v2118_v2, %v1936_v9 }
 0x37a   : > { %v1959_v62 = vmax.f32 %v1951_v22, 0.0  ;;  %v1919_v33 = vpop.f32.mrb[10].mxu1 }
 0x37b   : > { %v1937_v16 = vmul.f32 %v2117_v11, %v1919_v33  ;;  %v1921_v59 = vpop.f32.mrb[11].mxu1 }
 0x37c   : > { %1967 = vst.msk [vmem:[%s3593_s21 + $0x30] sm:$0xff] %vm3706_vm6, %v1959_v62 }
 0x37d   : > { %v1952_v23 = vadd.f32 %v2118_v2, %v1937_v16 }
 0x37f   : > { %v1960_v4 = vmax.f32 %v1952_v23, 0.0 }
 0x381   : > { %1968 = vst.msk [vmem:[%s3593_s21 + $0x38] sm:$0xff] %vm3707_vm7, %v1960_v4 }
 0x382   : > { %2289 = shalt.err (!%p2286_p3)
}
 0x383   : > { %s2290_s25 = scalar_lea.hbm %s3614_s13, 1024  ;;  %s2294_s18 = scalar_lea.hbm %s3672_s8, 2048 }
 0x384   : > { %p2291_p4 = scmp.ne.s32.totalorder %s3614_s13, %s2290_s25  ;;  %p2295_p9 = scmp.lt.u32.totalorder %s3614_s13, %s3672_s8 }
 0x385   : > { %p2296_p10 = scmp.lt.u32.totalorder %s2294_s18, %s2290_s25  ;;  %p2298_p12 = scmp.lt.u32.totalorder %s2290_s25, %s3614_s13 }
 0x386   : > { %p2292_p7 = pnand %p2291_p4, %p2446_p5 }
 0x387   : > { %p2297_p11 = por %p2296_p10, %p2295_p9 }
 0x388   : > { %p2293_p8 = pneg %p2292_p7 }
 0x389   : > { %p2299_p13 = por %p2298_p12, %p2297_p11 }
 0x38b   : > { %p2300_p0 = pnand %p2299_p13, %p2293_p8 }
 0x38d   : > { %2303 = shalt.err (!%p2300_p0)
}
 0x38e   : > { %s2362_s23 = smov 128  }
 0x38f   : > { %2215 = dma.vmem_to_hbm [thread:$0]  (%p2446_p5), %s3616_s26, 1024, %s3614_s13, %s3622_s17, %s2362_s23, %s2362_s23, %s3685_s12  }
 0x390 PF: > { %p2221_p1 = scmp.ge.s32.totalorder %s2338_s30, 2  ;;  %s1998_s9 = sand.u32 1, %s2326_s27  }
 0x391   : > { %s1999_s10 = scalar_lea.sflag [#allocation7], %s1998_s9 }
 0x392   : > { %p2218_p2 = pnand %p2221_p1, %p2450_p6 }
 0x394   : > { %2321 = dma.done.wait (!%p2218_p2), %s1999_s10, 1024  }
 0x395   : > { %2323 = vsyncadd (!%p2218_p2), %s1999_s10, 4294966272  ;;  %p18_p3 = scmp.ge.s32.totalorder %s2433_s11, 4   ;;  %s3708_s27 = smov %s2330_s28 }
 0x396   : > { %s3709_s28 = smov %s2334_s29  ;;  %s3710_s29 = smov %s2444_s14 }
 0x397   : > { %s3711_s30 = smov %s2433_s11  ;;  %20 = sbr.rel (!%p18_p3) target bundleno = 3 (0x3), region = 95 }
 0x39e   :  { %2004 = vsyncpa [#allocation7], 1 }
 0x39f   :  { %2006 = vsyncpa [#allocation7 + $0x1], 1 }

</bundles_post_ra>
